<compile_context>
chip_gen: v5e
topology: v5e:2x2
jax: 0.10.0
libtpu: 0.0.40
codegen_flags: <defaults>
</compile_context>

<pallas_src>
import functools
import itertools

import jax
import jax.numpy as jnp
from jax import lax
from jax.experimental import pallas as pl
from jax.experimental.pallas import tpu as pltpu

H = 768  # BERT hidden size, fixed by linear1 = nn.Linear(768, N)


def _log_softmax(x):
    # f32 softmax math (exp/log on the EUP in f32).
    m = jnp.max(x, axis=-1, keepdims=True)
    z = x - m
    return z - jnp.log(jnp.sum(jnp.exp(z), axis=-1, keepdims=True))


def _sum_last2(x):
    # (Be, A, C) -> (Be, 1): reduce the two minor dims, keep per-episode axis.
    return jnp.sum(jnp.sum(x, axis=-1), axis=-1, keepdims=True)


# -----------------------------------------------------------------------------
# Fused kernel: one grid step == Be independent few-shot episodes.
# -----------------------------------------------------------------------------
def _ctnet_kernel(labels_ref,   # (Be, Q, 1)   i32  VMEM  query labels
                  s_ref,        # (Be, NK, H)  bf16 VMEM  support CLS
                  q_ref,        # (Be, Q, H)   bf16 VMEM  query CLS
                  w_ref,        # (N, H)       f32  VMEM  linear1.weight
                  b_ref,        # (1, N)       f32  VMEM  linear1.bias
                  loss_ref,     # (1, Be, 1)   f32  out   per-episode loss
                  logits_ref,   # (Be, Q, LN)  f32  out   metric logits (lane padded)
                  x_scr,        # (Be, NK+Q+N, H) f32 VMEM scratch: [s ; q ; w]
                  *, l_coef):
    be, nk, h = s_ref.shape
    qn = q_ref.shape[1]
    n = w_ref.shape[0]
    ln = logits_ref.shape[2]

    # bf16 over HBM, f32 math in VMEM (keeps Gram-form distances accurate).
    s_f = s_ref[...].astype(jnp.float32)
    q_f = q_ref[...].astype(jnp.float32)
    w_f = w_ref[...]

    # ---- one fused per-episode Gram: [s ; q ; w] @ [s ; q ; w]^T -------------
    # Gives support/support, query/support, query/query (for the norms) and the
    # lm-head logits (support . weight^T) in a single batched MXU matmul.
    x_scr[:, 0:nk, :] = s_f
    x_scr[:, nk:nk + qn, :] = q_f
    x_scr[:, nk + qn:, :] = jnp.broadcast_to(w_f[None, :, :], (be, n, h))
    x = x_scr[...]
    g = jnp.einsum('bid,bjd->bij', x, x,
                   preferred_element_type=jnp.float32)        # (Be, T, T)

    ss = g[:, :nk, :nk]                    # support x support (Be, NK, NK)
    qs = g[:, nk:nk + qn, :nk]             # query   x support (Be, Q,  NK)
    qq = g[:, nk:nk + qn, nk:nk + qn]      # query   x query   (Be, Q,  Q)
    lm_logits = g[:, :nk, nk + qn:] + b_ref[...]              # (Be, NK, N)

    # Squared norms straight from the Gram diagonals (no 768-wide reductions).
    eye_s = (lax.broadcasted_iota(jnp.int32, (nk, nk), 0)
             == lax.broadcasted_iota(jnp.int32, (nk, nk), 1))
    eye_q = (lax.broadcasted_iota(jnp.int32, (qn, qn), 0)
             == lax.broadcasted_iota(jnp.int32, (qn, qn), 1))
    ss_diag = jnp.where(eye_s, ss, 0.0)
    s_sq_lane = jnp.sum(ss_diag, axis=1, keepdims=True)        # (Be, 1, NK)
    s_sq_sub = jnp.sum(ss_diag, axis=2, keepdims=True)         # (Be, NK, 1)
    q_sq_sub = jnp.sum(jnp.where(eye_q, qq, 0.0),
                       axis=2, keepdims=True)                  # (Be, Q, 1)

    # ---- metric logits: -||q - p||   (K == 1 -> prototype == support row) ----
    d2 = jnp.maximum(q_sq_sub + s_sq_lane - 2.0 * qs, 0.0)     # clamp rounding
    logits = -jnp.sqrt(d2)                                      # (Be, Q, NK)

    # Lane-dense (128-wide) padded output block; wrapper slices [..., :N].
    logits_ref[...] = jnp.zeros((be, qn, ln), jnp.float32)
    logits_ref[:, :, :nk] = logits

    # ---- query NLL (one-hot via a single vector compare against VMEM labels) -
    logp = _log_softmax(logits)
    lbl = labels_ref[...]                                       # (Be, Q, 1) i32
    col_q = lax.broadcasted_iota(jnp.int32, (be, qn, nk), 2)
    onehot = col_q == lbl
    main_loss = -_sum_last2(jnp.where(onehot, logp, 0.0)) / qn  # (Be, 1)

    # ---- lm-head NLL (K == 1: per-episode label pattern == identity) ---------
    # TODO(synk): K > 1 would need (row % N) == col here.
    lm_logp = _log_softmax(lm_logits)
    lm_onehot = (lax.broadcasted_iota(jnp.int32, (be, nk, n), 1)
                 == lax.broadcasted_iota(jnp.int32, (be, nk, n), 2))
    lm_loss = -_sum_last2(jnp.where(lm_onehot, lm_logp, 0.0)) / nk  # (Be, 1)

    # ---- dd loss (K == 1): pairwise support-prototype distances, Gram form ---
    sd2 = jnp.maximum(s_sq_sub + s_sq_lane - 2.0 * ss, 0.0)
    sd2 = jnp.where(eye_s, 0.0, sd2)            # exact-zero diagonal
    dd = 0.5 * _sum_last2(jnp.sqrt(sd2))        # (Be, 1) == sum over i < j
    num_pairs = float(nk * (nk - 1)) / 2.0
    # Matches the reference exactly; dd == 0 (coincident prototypes) -> inf.
    dd_loss = num_pairs / dd

    loss_ref[0] = main_loss * dd_loss + l_coef * lm_loss


# -----------------------------------------------------------------------------
# Wrappers.
# -----------------------------------------------------------------------------
def ctnet_forward_batched(support_cls, query_cls, labels, w1, b1, *, K=1, l=0.0,
                          episodes_per_block=None):
    """Fused CTNet post-BERT forward for B independent episodes.

    support_cls: (B, N*K, 768), query_cls: (B, Q, 768), labels: (B, Q) int,
    w1: (N, 768) = linear1.weight (PyTorch layout), b1: (N,) = linear1.bias.
    Returns (loss[B], logits[B, Q, N]).
    """
    assert K == 1, "only the default K=1 path is implemented"
    B, NK, h = support_cls.shape
    _, Q, _ = query_cls.shape
    N = w1.shape[0]
    assert h == H and NK == N * K

    if episodes_per_block is None:
        episodes_per_block = min(B, 8)
    Be = max(1, min(B, int(episodes_per_block)))
    while B % Be:               # Be must divide B (episodes per grid step)
        Be -= 1
    steps = B // Be
    LN = max(128, -(-N // 128) * 128)      # lane-dense logits width
    T = NK + Q + N                          # rows of the fused Gram input

    kernel = functools.partial(_ctnet_kernel, l_coef=float(l))
    grid_spec = pltpu.PrefetchScalarGridSpec(
        num_scalar_prefetch=0,
        grid=(steps,),                                        # Be episodes / step
        in_specs=[
            pl.BlockSpec((Be, Q, 1), lambda g: (g, 0, 0)),    # labels (VMEM)
            pl.BlockSpec((Be, NK, H), lambda g: (g, 0, 0)),   # support CLS
            pl.BlockSpec((Be, Q, H), lambda g: (g, 0, 0)),    # query CLS
            pl.BlockSpec((N, H), lambda g: (0, 0)),           # shared weight
            pl.BlockSpec((1, N), lambda g: (0, 0)),           # shared bias
        ],
        out_specs=(
            pl.BlockSpec((1, Be, 1), lambda g: (g, 0, 0)),    # per-episode loss
            pl.BlockSpec((Be, Q, LN), lambda g: (g, 0, 0)),   # padded logits
        ),
        scratch_shapes=[pltpu.VMEM((Be, T, H), jnp.float32)],
    )
    loss, logits_padded = pl.pallas_call(
        kernel,
        out_shape=(
            jax.ShapeDtypeStruct((steps, Be, 1), jnp.float32),
            jax.ShapeDtypeStruct((B, Q, LN), jnp.float32),
        ),
        grid_spec=grid_spec,
        compiler_params=pltpu.CompilerParams(
            dimension_semantics=("parallel",)),   # episode blocks shard across TCs
    )(
        labels.astype(jnp.int32).reshape(B, Q, 1),
        support_cls.astype(jnp.bfloat16),         # halve HBM->VMEM input traffic
        query_cls.astype(jnp.bfloat16),
        w1.astype(jnp.float32),
        b1.reshape(1, -1).astype(jnp.float32),
    )
    return loss.reshape(B), logits_padded[:, :, :N]


def ctnet_forward(support_cls, query_cls, labels, w1, b1, N, K, l):
    """Single-episode forward (mirrors CTNet.forward after the BERT encoder)."""
    loss, logits = ctnet_forward_batched(
        support_cls[None], query_cls[None], labels[None], w1, b1, K=K, l=l,
        episodes_per_block=1)
    return loss[0], logits[0]


# -----------------------------------------------------------------------------
# Pure-JAX reference (mirrors the PyTorch code path literally, full f32).
# -----------------------------------------------------------------------------
def ctnet_forward_ref(support_cls, query_cls, labels, w1, b1, N, K, l):
    s = support_cls.astype(jnp.float32)
    q = query_cls.astype(jnp.float32)
    lm_logits = jnp.einsum('kd,nd->kn', s, w1.astype(jnp.float32),
                           precision=lax.Precision.HIGHEST) + b1
    lm_pred = jax.nn.log_softmax(lm_logits, axis=-1)
    lm_label = jnp.tile(jnp.arange(N), K)
    lm_loss = -jnp.mean(lm_pred[jnp.arange(N * K), lm_label])
    proto = s.reshape(-1, K, s.shape[-1]).mean(axis=1)          # (N, 768)
    logits = -jnp.sqrt(jnp.sum((proto[None, :, :] - q[:, None, :]) ** 2, axis=-1))
    pred = jax.nn.log_softmax(logits, axis=-1)
    tar = list(itertools.combinations(range(proto.shape[0]), 2))
    dd = 0.0
    for i, j in tar:
        dd += jnp.sqrt(jnp.sum((proto[i] - proto[j]) ** 2))
    dd_loss = len(tar) / dd
    loss = -jnp.mean(pred[jnp.arange(labels.shape[0]), labels]) * dd_loss
    return loss + l * lm_loss, logits


if __name__ == "__main__":
    B, N, K, Q = 8, 5, 1, 5    # 8 episodes of 5-way 1-shot with 5 queries each
    l_coef = 0.25              # self.l (loss mixing weight)

    key = jax.random.PRNGKey(0)
    k1, k2, k3, k4, k5 = jax.random.split(key, 5)

    # Synthetic CLS embeddings standing in for the BERT encoder outputs.
    support_cls = jax.random.normal(k1, (B, N * K, H), dtype=jnp.float32)
    query_cls = jax.random.normal(k2, (B, Q, H), dtype=jnp.float32)

    # linear1 = nn.Linear(768, N): weight (N, 768), bias (N,).
    bound = 1.0 / (H ** 0.5)
    w1 = jax.random.uniform(k3, (N, H), minval=-bound, maxval=bound, dtype=jnp.float32)
    b1 = jax.random.uniform(k4, (N,), minval=-bound, maxval=bound, dtype=jnp.float32)
    labels = jax.random.randint(k5, (B, Q), 0, N, dtype=jnp.int32)

    # Batched path: 4 episodes per grid step -> 2 grid steps (both v7x TCs busy).
    loss, logits = ctnet_forward_batched(
        support_cls, query_cls, labels, w1, b1, K=K, l=l_coef, episodes_per_block=4)
    jax.block_until_ready((loss, logits))

    # Single-episode path must agree with the batched path.
    loss0, logits0 = ctnet_forward(
        support_cls[0], query_cls[0], labels[0], w1, b1, N, K, l_coef)
    jax.block_until_ready((loss0, logits0))
    assert jnp.allclose(loss0, loss[0], rtol=1e-5, atol=1e-5)
    assert jnp.allclose(logits0, logits[0], rtol=1e-5, atol=1e-5)

    # References: (a) inputs rounded to bf16 exactly as shipped to the kernel
    # (tight check), (b) literal f32 PyTorch mirror (loose check; the only
    # intentional deviation is the bf16 quantization of the HBM inputs).
    s_bf = support_cls.astype(jnp.bfloat16).astype(jnp.float32)
    q_bf = query_cls.astype(jnp.bfloat16).astype(jnp.float32)
    for b in range(B):
        loss_bf, logits_bf = ctnet_forward_ref(
            s_bf[b], q_bf[b], labels[b], w1, b1, N, K, l_coef)
        loss_f32, logits_f32 = ctnet_forward_ref(
            support_cls[b], query_cls[b], labels[b], w1, b1, N, K, l_coef)

        assert jnp.allclose(logits[b], logits_bf, rtol=1e-4, atol=1e-4), "logits mismatch (bf16-aware ref)"
        assert jnp.allclose(loss[b], loss_bf, rtol=1e-4, atol=1e-4), "loss mismatch (bf16-aware ref)"
        assert jnp.allclose(logits[b], logits_f32, rtol=2e-3, atol=2e-3), "logits mismatch (f32 ref)"
        assert jnp.allclose(loss[b], loss_f32, rtol=5e-3, atol=5e-3), "loss mismatch (f32 ref)"

    print("KERNEL_OK")
</pallas_src>

<mosaic_0001>
module attributes {stable_mosaic.version = 11 : i64} {
  func.func @_ctnet_kernel(%arg0: i32, %arg1: memref<4x5x1xi32, #tpu.memory_space<vmem>>, %arg2: memref<4x5x768xbf16, #tpu.memory_space<vmem>>, %arg3: memref<4x5x768xbf16, #tpu.memory_space<vmem>>, %arg4: memref<5x768xf32, #tpu.memory_space<vmem>>, %arg5: memref<1x5xf32, #tpu.memory_space<vmem>>, %arg6: memref<1x4x1xf32, #tpu.memory_space<vmem>>, %arg7: memref<4x5x128xf32, #tpu.memory_space<vmem>>, %arg8: memref<4x15x768xf32, #tpu.memory_space<vmem>>) attributes {dimension_semantics = [#tpu.dimension_semantics<parallel>], iteration_bounds = array<i64: 2>, scalar_prefetch = 0 : i64, scratch_operands = 1 : i64, tpu.core_type = #tpu.core_type<tc>, window_params = [{transform_indices = @transform_0, window_bounds = array<i64: 4, 5, 1>}, {transform_indices = @transform_1, window_bounds = array<i64: 4, 5, 768>}, {transform_indices = @transform_2, window_bounds = array<i64: 4, 5, 768>}, {pipeline_mode = #tpu.pipeline_mode<synchronous>, transform_indices = @transform_3, window_bounds = array<i64: 5, 768>}, {pipeline_mode = #tpu.pipeline_mode<synchronous>, transform_indices = @transform_4, window_bounds = array<i64: 1, 5>}, {transform_indices = @transform_5, window_bounds = array<i64: 1, 4, 1>}, {transform_indices = @transform_6, window_bounds = array<i64: 4, 5, 128>}]} {
    %c0 = arith.constant 0 : index
    %c0_0 = arith.constant 0 : index
    %c0_1 = arith.constant 0 : index
    %0 = vector.load %arg2[%c0, %c0_0, %c0_1] : memref<4x5x768xbf16, #tpu.memory_space<vmem>>, vector<4x5x768xbf16>
    %1 = arith.extf %0 : vector<4x5x768xbf16> to vector<4x5x768xf32>
    %c0_2 = arith.constant 0 : index
    %c0_3 = arith.constant 0 : index
    %c0_4 = arith.constant 0 : index
    %2 = vector.load %arg3[%c0_2, %c0_3, %c0_4] : memref<4x5x768xbf16, #tpu.memory_space<vmem>>, vector<4x5x768xbf16>
    %3 = arith.extf %2 : vector<4x5x768xbf16> to vector<4x5x768xf32>
    %c0_5 = arith.constant 0 : index
    %c0_6 = arith.constant 0 : index
    %4 = vector.load %arg4[%c0_5, %c0_6] : memref<5x768xf32, #tpu.memory_space<vmem>>, vector<5x768xf32>
    %c0_7 = arith.constant 0 : index
    %c0_8 = arith.constant 0 : index
    %c0_9 = arith.constant 0 : index
    %5 = vector.load %arg8[%c0_7, %c0_8, %c0_9] : memref<4x15x768xf32, #tpu.memory_space<vmem>>, vector<4x5x768xf32>
    tpu.vector_store %arg8[%c0_7, %c0_8, %c0_9], %1 {strides = array<i32>} : memref<4x15x768xf32, #tpu.memory_space<vmem>>, vector<4x5x768xf32>,
    %c0_10 = arith.constant 0 : index
    %c5 = arith.constant 5 : index
    %c0_11 = arith.constant 0 : index
    %6 = vector.load %arg8[%c0_10, %c5, %c0_11] : memref<4x15x768xf32, #tpu.memory_space<vmem>>, vector<4x5x768xf32>
    tpu.vector_store %arg8[%c0_10, %c5, %c0_11], %3 {strides = array<i32>} : memref<4x15x768xf32, #tpu.memory_space<vmem>>, vector<4x5x768xf32>,
    %7 = vector.shape_cast %4 : vector<5x768xf32> to vector<1x5x768xf32>
    %8 = vector.shape_cast %7 : vector<1x5x768xf32> to vector<1x5x768xf32>
    %9 = vector.broadcast %8 : vector<1x5x768xf32> to vector<4x5x768xf32>
    %c0_12 = arith.constant 0 : index
    %c10 = arith.constant 10 : index
    %c0_13 = arith.constant 0 : index
    %10 = vector.load %arg8[%c0_12, %c10, %c0_13] : memref<4x15x768xf32, #tpu.memory_space<vmem>>, vector<4x5x768xf32>
    tpu.vector_store %arg8[%c0_12, %c10, %c0_13], %9 {strides = array<i32>} : memref<4x15x768xf32, #tpu.memory_space<vmem>>, vector<4x5x768xf32>,
    %c0_14 = arith.constant 0 : index
    %c0_15 = arith.constant 0 : index
    %c0_16 = arith.constant 0 : index
    %11 = vector.load %arg8[%c0_14, %c0_15, %c0_16] : memref<4x15x768xf32, #tpu.memory_space<vmem>>, vector<4x15x768xf32>
    "tpu.trace_start"() <{level = 10 : i32, message = "bid,bjd->bij"}> : () -> ()
    %cst = arith.constant dense<0.000000e+00> : vector<4x15x15xf32>
    %12 = tpu.matmul %11, %11, %cst {dimension_numbers = #tpu.dot_dimension_numbers<[2], [2], [1], [1], [0, 0, 0, 1, 1, 1], [0], [0]>} : vector<4x15x768xf32>, vector<4x15x768xf32>, vector<4x15x15xf32> -> vector<4x15x15xf32>
    "tpu.trace_stop"() : () -> ()
    %13 = vector.extract_strided_slice %12 {offsets = [0, 0, 0], sizes = [4, 5, 5], strides = [1, 1, 1]} : vector<4x15x15xf32> to vector<4x5x5xf32>
    %14 = vector.extract_strided_slice %12 {offsets = [0, 5, 0], sizes = [4, 5, 5], strides = [1, 1, 1]} : vector<4x15x15xf32> to vector<4x5x5xf32>
    %15 = vector.extract_strided_slice %12 {offsets = [0, 5, 5], sizes = [4, 5, 5], strides = [1, 1, 1]} : vector<4x15x15xf32> to vector<4x5x5xf32>
    %16 = vector.extract_strided_slice %12 {offsets = [0, 0, 10], sizes = [4, 5, 5], strides = [1, 1, 1]} : vector<4x15x15xf32> to vector<4x5x5xf32>
    %c0_17 = arith.constant 0 : index
    %c0_18 = arith.constant 0 : index
    %17 = vector.load %arg5[%c0_17, %c0_18] : memref<1x5xf32, #tpu.memory_space<vmem>>, vector<1x5xf32>
    %18 = vector.shape_cast %17 : vector<1x5xf32> to vector<1x1x5xf32>
    %19 = vector.broadcast %18 : vector<1x1x5xf32> to vector<4x5x5xf32>
    %20 = arith.addf %16, %19 : vector<4x5x5xf32>
    %21 = tpu.iota {dimensions = array<i32: 0>} : vector<5x5xi32>
    %22 = tpu.iota {dimensions = array<i32: 1>} : vector<5x5xi32>
    %23 = arith.cmpi eq, %21, %22 : vector<5x5xi32>
    %24 = tpu.iota {dimensions = array<i32: 0>} : vector<5x5xi32>
    %25 = tpu.iota {dimensions = array<i32: 1>} : vector<5x5xi32>
    %26 = arith.cmpi eq, %24, %25 : vector<5x5xi32>
    %cst_19 = arith.constant 0.000000e+00 : f32
    %27 = vector.shape_cast %23 : vector<5x5xi1> to vector<1x5x5xi1>
    %28 = vector.broadcast %27 : vector<1x5x5xi1> to vector<4x5x5xi1>
    %29 = vector.broadcast %cst_19 : f32 to vector<4x5x5xf32>
    %30 = arith.select %28, %13, %29 : vector<4x5x5xi1>, vector<4x5x5xf32>
    %cst_20 = arith.constant dense<0.000000e+00> : vector<4x5xf32>
    %31 = vector.multi_reduction <add>, %30, %cst_20 [1] : vector<4x5x5xf32> to vector<4x5xf32>
    %32 = vector.shape_cast %31 : vector<4x5xf32> to vector<4x1x5xf32>
    %cst_21 = arith.constant dense<0.000000e+00> : vector<4x5xf32>
    %33 = vector.multi_reduction <add>, %30, %cst_21 [2] : vector<4x5x5xf32> to vector<4x5xf32>
    %34 = vector.shape_cast %33 : vector<4x5xf32> to vector<4x5x1xf32>
    %cst_22 = arith.constant 0.000000e+00 : f32
    %35 = vector.shape_cast %26 : vector<5x5xi1> to vector<1x5x5xi1>
    %36 = vector.broadcast %35 : vector<1x5x5xi1> to vector<4x5x5xi1>
    %37 = vector.broadcast %cst_22 : f32 to vector<4x5x5xf32>
    %38 = arith.select %36, %15, %37 : vector<4x5x5xi1>, vector<4x5x5xf32>
    %cst_23 = arith.constant dense<0.000000e+00> : vector<4x5xf32>
    %39 = vector.multi_reduction <add>, %38, %cst_23 [2] : vector<4x5x5xf32> to vector<4x5xf32>
    %40 = vector.shape_cast %39 : vector<4x5xf32> to vector<4x5x1xf32>
    %41 = vector.broadcast %40 : vector<4x5x1xf32> to vector<4x5x5xf32>
    %42 = vector.broadcast %32 : vector<4x1x5xf32> to vector<4x5x5xf32>
    %43 = arith.addf %41, %42 : vector<4x5x5xf32>
    %cst_24 = arith.constant 2.000000e+00 : f32
    %44 = vector.broadcast %cst_24 : f32 to vector<4x5x5xf32>
    %45 = arith.mulf %44, %14 : vector<4x5x5xf32>
    %46 = arith.subf %43, %45 : vector<4x5x5xf32>
    %cst_25 = arith.constant 0.000000e+00 : f32
    %47 = vector.broadcast %cst_25 : f32 to vector<4x5x5xf32>
    %48 = arith.maximumf %46, %47 : vector<4x5x5xf32>
    %49 = math.sqrt %48 : vector<4x5x5xf32>
    %cst_26 = arith.constant 0.000000e+00 : f32
    %50 = vector.broadcast %cst_26 : f32 to vector<4x5x5xf32>
    %51 = arith.subf %50, %49 : vector<4x5x5xf32>
    %cst_27 = arith.constant 0.000000e+00 : f32
    %52 = vector.broadcast %cst_27 : f32 to vector<4x5x128xf32>
    %c0_28 = arith.constant 0 : index
    %c0_29 = arith.constant 0 : index
    %c0_30 = arith.constant 0 : index
    %53 = vector.load %arg7[%c0_28, %c0_29, %c0_30] : memref<4x5x128xf32, #tpu.memory_space<vmem>>, vector<4x5x128xf32>
    tpu.vector_store %arg7[%c0_28, %c0_29, %c0_30], %52 {strides = array<i32>} : memref<4x5x128xf32, #tpu.memory_space<vmem>>, vector<4x5x128xf32>,
    %c0_31 = arith.constant 0 : index
    %c0_32 = arith.constant 0 : index
    %c0_33 = arith.constant 0 : index
    %54 = vector.load %arg7[%c0_31, %c0_32, %c0_33] : memref<4x5x128xf32, #tpu.memory_space<vmem>>, vector<4x5x5xf32>
    tpu.vector_store %arg7[%c0_31, %c0_32, %c0_33], %51 {strides = array<i32>} : memref<4x5x128xf32, #tpu.memory_space<vmem>>, vector<4x5x5xf32>,
    %cst_34 = arith.constant dense<0xFF800000> : vector<4x5xf32>
    %55 = vector.multi_reduction <maximumf>, %51, %cst_34 [2] : vector<4x5x5xf32> to vector<4x5xf32>
    %56 = vector.shape_cast %55 : vector<4x5xf32> to vector<4x5x1xf32>
    %57 = vector.broadcast %56 : vector<4x5x1xf32> to vector<4x5x5xf32>
    %58 = arith.subf %51, %57 : vector<4x5x5xf32>
    %59 = math.exp %58 : vector<4x5x5xf32>
    %cst_35 = arith.constant dense<0.000000e+00> : vector<4x5xf32>
    %60 = vector.multi_reduction <add>, %59, %cst_35 [2] : vector<4x5x5xf32> to vector<4x5xf32>
    %61 = vector.shape_cast %60 : vector<4x5xf32> to vector<4x5x1xf32>
    %62 = math.log %61 : vector<4x5x1xf32>
    %63 = vector.broadcast %62 : vector<4x5x1xf32> to vector<4x5x5xf32>
    %64 = arith.subf %58, %63 : vector<4x5x5xf32>
    %c0_36 = arith.constant 0 : index
    %c0_37 = arith.constant 0 : index
    %c0_38 = arith.constant 0 : index
    %65 = vector.load %arg1[%c0_36, %c0_37, %c0_38] : memref<4x5x1xi32, #tpu.memory_space<vmem>>, vector<4x5x1xi32>
    %66 = tpu.iota {dimensions = array<i32: 2>} : vector<4x5x5xi32>
    %67 = vector.broadcast %65 : vector<4x5x1xi32> to vector<4x5x5xi32>
    %68 = arith.cmpi eq, %66, %67 : vector<4x5x5xi32>
    %cst_39 = arith.constant 0.000000e+00 : f32
    %69 = vector.broadcast %cst_39 : f32 to vector<4x5x5xf32>
    %70 = arith.select %68, %64, %69 : vector<4x5x5xi1>, vector<4x5x5xf32>
    %cst_40 = arith.constant dense<0.000000e+00> : vector<4x5xf32>
    %71 = vector.multi_reduction <add>, %70, %cst_40 [2] : vector<4x5x5xf32> to vector<4x5xf32>
    %cst_41 = arith.constant dense<0.000000e+00> : vector<4xf32>
    %72 = vector.multi_reduction <add>, %71, %cst_41 [1] : vector<4x5xf32> to vector<4xf32>
    %73 = vector.shape_cast %72 : vector<4xf32> to vector<4x1xf32>
    %cst_42 = arith.constant 0.000000e+00 : f32
    %74 = vector.broadcast %cst_42 : f32 to vector<4x1xf32>
    %75 = arith.subf %74, %73 : vector<4x1xf32>
    %cst_43 = arith.constant 5.000000e+00 : f32
    %76 = vector.broadcast %cst_43 : f32 to vector<4x1xf32>
    %77 = arith.divf %75, %76 : vector<4x1xf32>
    %cst_44 = arith.constant dense<0xFF800000> : vector<4x5xf32>
    %78 = vector.multi_reduction <maximumf>, %20, %cst_44 [2] : vector<4x5x5xf32> to vector<4x5xf32>
    %79 = vector.shape_cast %78 : vector<4x5xf32> to vector<4x5x1xf32>
    %80 = vector.broadcast %79 : vector<4x5x1xf32> to vector<4x5x5xf32>
    %81 = arith.subf %20, %80 : vector<4x5x5xf32>
    %82 = math.exp %81 : vector<4x5x5xf32>
    %cst_45 = arith.constant dense<0.000000e+00> : vector<4x5xf32>
    %83 = vector.multi_reduction <add>, %82, %cst_45 [2] : vector<4x5x5xf32> to vector<4x5xf32>
    %84 = vector.shape_cast %83 : vector<4x5xf32> to vector<4x5x1xf32>
    %85 = math.log %84 : vector<4x5x1xf32>
    %86 = vector.broadcast %85 : vector<4x5x1xf32> to vector<4x5x5xf32>
    %87 = arith.subf %81, %86 : vector<4x5x5xf32>
    %88 = tpu.iota {dimensions = array<i32: 1>} : vector<4x5x5xi32>
    %89 = tpu.iota {dimensions = array<i32: 2>} : vector<4x5x5xi32>
    %90 = arith.cmpi eq, %88, %89 : vector<4x5x5xi32>
    %cst_46 = arith.constant 0.000000e+00 : f32
    %91 = vector.broadcast %cst_46 : f32 to vector<4x5x5xf32>
    %92 = arith.select %90, %87, %91 : vector<4x5x5xi1>, vector<4x5x5xf32>
    %cst_47 = arith.constant dense<0.000000e+00> : vector<4x5xf32>
    %93 = vector.multi_reduction <add>, %92, %cst_47 [2] : vector<4x5x5xf32> to vector<4x5xf32>
    %cst_48 = arith.constant dense<0.000000e+00> : vector<4xf32>
    %94 = vector.multi_reduction <add>, %93, %cst_48 [1] : vector<4x5xf32> to vector<4xf32>
    %95 = vector.shape_cast %94 : vector<4xf32> to vector<4x1xf32>
    %cst_49 = arith.constant 0.000000e+00 : f32
    %96 = vector.broadcast %cst_49 : f32 to vector<4x1xf32>
    %97 = arith.subf %96, %95 : vector<4x1xf32>
    %cst_50 = arith.constant 5.000000e+00 : f32
    %98 = vector.broadcast %cst_50 : f32 to vector<4x1xf32>
    %99 = arith.divf %97, %98 : vector<4x1xf32>
    %100 = vector.broadcast %34 : vector<4x5x1xf32> to vector<4x5x5xf32>
    %101 = vector.broadcast %32 : vector<4x1x5xf32> to vector<4x5x5xf32>
    %102 = arith.addf %100, %101 : vector<4x5x5xf32>
    %cst_51 = arith.constant 2.000000e+00 : f32
    %103 = vector.broadcast %cst_51 : f32 to vector<4x5x5xf32>
    %104 = arith.mulf %103, %13 : vector<4x5x5xf32>
    %105 = arith.subf %102, %104 : vector<4x5x5xf32>
    %cst_52 = arith.constant 0.000000e+00 : f32
    %106 = vector.broadcast %cst_52 : f32 to vector<4x5x5xf32>
    %107 = arith.maximumf %105, %106 : vector<4x5x5xf32>
    %cst_53 = arith.constant 0.000000e+00 : f32
    %108 = vector.shape_cast %23 : vector<5x5xi1> to vector<1x5x5xi1>
    %109 = vector.broadcast %108 : vector<1x5x5xi1> to vector<4x5x5xi1>
    %110 = vector.broadcast %cst_53 : f32 to vector<4x5x5xf32>
    %111 = arith.select %109, %110, %107 : vector<4x5x5xi1>, vector<4x5x5xf32>
    %112 = math.sqrt %111 : vector<4x5x5xf32>
    %cst_54 = arith.constant dense<0.000000e+00> : vector<4x5xf32>
    %113 = vector.multi_reduction <add>, %112, %cst_54 [2] : vector<4x5x5xf32> to vector<4x5xf32>
    %cst_55 = arith.constant dense<0.000000e+00> : vector<4xf32>
    %114 = vector.multi_reduction <add>, %113, %cst_55 [1] : vector<4x5xf32> to vector<4xf32>
    %115 = vector.shape_cast %114 : vector<4xf32> to vector<4x1xf32>
    %cst_56 = arith.constant 5.000000e-01 : f32
    %116 = vector.broadcast %cst_56 : f32 to vector<4x1xf32>
    %117 = arith.mulf %116, %115 : vector<4x1xf32>
    %cst_57 = arith.constant 1.000000e+01 : f32
    %118 = vector.broadcast %cst_57 : f32 to vector<4x1xf32>
    %119 = arith.divf %118, %117 : vector<4x1xf32>
    %120 = arith.mulf %77, %119 : vector<4x1xf32>
    %cst_58 = arith.constant 2.500000e-01 : f32
    %121 = vector.broadcast %cst_58 : f32 to vector<4x1xf32>
    %122 = arith.mulf %121, %99 : vector<4x1xf32>
    %123 = arith.addf %120, %122 : vector<4x1xf32>
    %c0_59 = arith.constant 0 : index
    %c0_60 = arith.constant 0 : index
    %c0_61 = arith.constant 0 : index
    %124 = vector.load %arg6[%c0_59, %c0_60, %c0_61] : memref<1x4x1xf32, #tpu.memory_space<vmem>>, vector<1x4x1xf32>
    %125 = vector.shape_cast %124 : vector<1x4x1xf32> to vector<4x1xf32>
    %126 = vector.shape_cast %123 : vector<4x1xf32> to vector<1x4x1xf32>
    tpu.vector_store %arg6[%c0_59, %c0_60, %c0_61], %126 {strides = array<i32>} : memref<1x4x1xf32, #tpu.memory_space<vmem>>, vector<1x4x1xf32>,
    return
  }
  func.func @transform_0(%arg0: i32) -> (i32, i32, i32) {
    %c0_i32 = arith.constant 0 : i32
    %c0_i32_0 = arith.constant 0 : i32
    %c0_i32_1 = arith.constant 0 : i32
    return %arg0, %c0_i32, %c0_i32_0 : i32, i32, i32
  }
  func.func @transform_1(%arg0: i32) -> (i32, i32, i32) {
    %c0_i32 = arith.constant 0 : i32
    %c0_i32_0 = arith.constant 0 : i32
    %c0_i32_1 = arith.constant 0 : i32
    return %arg0, %c0_i32, %c0_i32_0 : i32, i32, i32
  }
  func.func @transform_2(%arg0: i32) -> (i32, i32, i32) {
    %c0_i32 = arith.constant 0 : i32
    %c0_i32_0 = arith.constant 0 : i32
    %c0_i32_1 = arith.constant 0 : i32
    return %arg0, %c0_i32, %c0_i32_0 : i32, i32, i32
  }
  func.func @transform_3(%arg0: i32) -> (i32, i32) {
    %c0_i32 = arith.constant 0 : i32
    %c0_i32_0 = arith.constant 0 : i32
    %c0_i32_1 = arith.constant 0 : i32
    return %c0_i32, %c0_i32_0 : i32, i32
  }
  func.func @transform_4(%arg0: i32) -> (i32, i32) {
    %c0_i32 = arith.constant 0 : i32
    %c0_i32_0 = arith.constant 0 : i32
    %c0_i32_1 = arith.constant 0 : i32
    return %c0_i32, %c0_i32_0 : i32, i32
  }
  func.func @transform_5(%arg0: i32) -> (i32, i32, i32) {
    %c0_i32 = arith.constant 0 : i32
    %c0_i32_0 = arith.constant 0 : i32
    %c0_i32_1 = arith.constant 0 : i32
    return %arg0, %c0_i32, %c0_i32_0 : i32, i32, i32
  }
  func.func @transform_6(%arg0: i32) -> (i32, i32, i32) {
    %c0_i32 = arith.constant 0 : i32
    %c0_i32_0 = arith.constant 0 : i32
    %c0_i32_1 = arith.constant 0 : i32
    return %arg0, %c0_i32, %c0_i32_0 : i32, i32, i32
  }
}

</mosaic_0001>

<bundles_post_ra>
// kernel: tpu_custom_call.1
= control target key start
LH: loop header
LB: loop body
LE: loop exit
PB: predicated region body
PF: predicated region fallthrough
CT: control target
= control target key end

     0   :  { %s1976_s21 = smov 0   ;;  %s2448_s0 = inlined_call_operand.vmem [shape: s32[8,5,1], index: 0, kind: input, shape index: {}]   ;;  %s2449_s1 = inlined_call_operand.vmem [shape: bf16[8,5,768], index: 1, kind: input, shape index: {}]   ;;  %s2450_s2 = inlined_call_operand.vmem [shape: bf16[8,5,768], index: 2, kind: input, shape index: {}]   ;;  %s2451_s3 = inlined_call_operand.vmem [shape: f32[5,768], index: 3, kind: input, shape index: {}]   ;;  %s2452_s4 = inlined_call_operand.vmem [shape: f32[1,5], index: 4, kind: input, shape index: {}]   ;;  %s2453_s5 = inlined_call_operand.vmem [shape: f32[2,4,1], index: 5, kind: output, shape index: {0}]   ;;  %s2454_s6 = inlined_call_operand.vmem [shape: f32[8,5,128], index: 6, kind: output, shape index: {1}]  }
   0x1 LB: > { %s1982_s22 = sadd.s32 4294967295, %s1933_s21   ;;  %p1844_p0 = scmp.ge.s32.totalorder %s1933_s21, 1  ;;  %s1933_s21 = sphi %s1976_s21, %s17_s21  }
   0x2   : > { %p240_p1 = scmp.lt.s32.totalorder %s1933_s21, 3 }
   0x4   : > { %p241_p2 = pnand %p1844_p0, %p240_p1 }
   0x5   : > { %s1845_s23 = sshll.u32 (!%p241_p2), %s1982_s22, 2  ;;  %s1935_s24 = smov (!%p241_p2), 10  }
   0x6   : > { %244 = sbr.rel (%p241_p2) target bundleno = 1120 (0x460), region = 40  ;;  %p287_p3 = scmp.lt.s32.totalorder (!%p241_p2), %s1845_s23, 7 }
   0x7   : > { %s1936_s25 = smov (!%p241_p2), 123   ;;  %s1937_s26 = smov (!%p241_p2), 118  }
   0x8   : > { %p306_p4 = scmp.lt.s32.totalorder (!%p241_p2), %s1982_s22, 1 }
   0xb   : > { %v388_v0 = vld [vmem:[%s2451_s3] sm:$0x1f]  ;;  %v390_v1 = vld [vmem:[%s2451_s3 + $0x10] sm:$0x1f]  ;;  %s2458_s23 = smov (!%p287_p3, %s1845_s23), 7  ;;  %vm1201_vm1 = vcmask 36864  }
   0xc   : > { %v544_v2 = vrot.slane %v388_v0, 6  ;;  %v546_v3 = vrot.slane %v390_v1, 6  ;;  %v391_v4 = vld [vmem:[%s2451_s3 + $0x18] sm:$0x1f]  ;;  %s1856_s30 = smul.u32 24, %s2458_s23  ;;  %vm1503_vm2 = vcmask 118864  }
   0xd   : > { %v547_v5 = vrot.slane %v391_v4, 6  ;;  %v389_v15 = vld [vmem:[%s2451_s3 + $0x8] sm:$0x1f]  ;;  %v392_v32 = vld [vmem:[%s2451_s3 + $0x20] sm:$0x1f]  ;;  %vm1246_vm3 = vcmask 1042432  }
   0xe   : > { %556 = vst [vmem:[#allocation2 + $0x58] sm:$0x7c] %v544_v2  ;;  %s2002_s9 = scalar_lea.vmem %s2450_s2, %s1856_s30  ;;  %s2012_s14 = scalar_lea.vmem %s2449_s1, %s1856_s30  ;;  %v545_v17 = vrot.slane %v389_v15, 6  ;;  %v548_v35 = vrot.slane %v392_v32, 6  ;;  %v393_v39 = vld [vmem:[%s2451_s3 + $0x28] sm:$0x1f] }
   0xf   : > { %562 = vst [vmem:[#allocation2 + $0x90] sm:$0x7c] %v544_v2  ;;  %v352_v6 = vld [vmem:[%s2002_s9] sm:$0x77]  ;;  %v353_v7 = vld [vmem:[%s2002_s9 + $0x8] sm:$0x77] }
  0x10   : > { %568 = vst [vmem:[#allocation2 + $0x30] sm:$0x7c] %v544_v2  ;;  %v364_v8 = vunpack.c.l.bf16 %v352_v6  ;;  %v366_v9 = vunpack.c.l.bf16 %v353_v7  ;;  %v367_v10 = vunpack.c.h.bf16 %v353_v7  ;;  %v365_v14 = vunpack.c.h.bf16 %v352_v6  ;;  %v316_v18 = vld [vmem:[%s2012_s14] sm:$0x77]  ;;  %v355_v20 = vld [vmem:[%s2002_s9 + $0x18] sm:$0x77] }
  0x11   : > { %574 = vst [vmem:[#allocation2 + $0x80] sm:$0x7c] %v544_v2  ;;  %v317_v21 = vld [vmem:[%s2012_s14 + $0x8] sm:$0x77]  ;;  %v354_v23 = vld [vmem:[%s2002_s9 + $0x10] sm:$0x77]  ;;  %v328_v24 = vunpack.c.l.bf16 %v316_v18  ;;  %v370_v25 = vunpack.c.l.bf16 %v355_v20  ;;  %v329_v30 = vunpack.c.h.bf16 %v316_v18  ;;  %v371_v36 = vunpack.c.h.bf16 %v355_v20 }
  0x12   : > { %558 = vst [vmem:[#allocation2 + $0x20] sm:$0x7c] %v546_v3  ;;  %v442_v11 = vrot.slane %v364_v8, 3  ;;  %v444_v12 = vrot.slane %v366_v9, 3  ;;  %v445_v13 = vrot.slane %v367_v10, 3  ;;  %v443_v16 = vrot.slane %v365_v14, 3 }
  0x13   : > { %564 = vst [vmem:[#allocation2 + $0xc0] sm:$0x7c] %v546_v3  ;;  %v330_v27 = vunpack.c.l.bf16 %v317_v21  ;;  %v331_v28 = vunpack.c.h.bf16 %v317_v21  ;;  %v368_v29 = vunpack.c.l.bf16 %v354_v23  ;;  %v448_v31 = vrot.slane %v370_v25, 3  ;;  %v1874_v47 = vld [vmem:[%s2452_s4] ss:$0 sm:$0xff]  ;;  %s1846_s27 = sshll.u32 %s2458_s23, 3 }
  0x14   : > { %570 = vst [vmem:[#allocation2 + $0x128] sm:$0x7c] %v546_v3  ;;  %v369_v37 = vunpack.c.h.bf16 %v354_v23  ;;  %v449_v41 = vrot.slane %v371_v36, 3  ;;  %v549_v45 = vrot.slane %v393_v39, 6  ;;  %v319_v48 = vld [vmem:[%s2012_s14 + $0x18] sm:$0x77]  ;;  %1183 = vrot.lane.b32.xlu0 %v1874_v47, %s1935_s24  ;;  %s2248_s30 = scalar_lea.vmem %s2454_s6, %s1846_s27 }
  0x15   : > { %576 = vst [vmem:[#allocation2 + $0xd0] sm:$0x7c] %v546_v3  ;;  %v446_v34 = vrot.slane %v368_v29, 3  ;;  %v357_v49 = vld [vmem:[%s2002_s9 + $0x28] sm:$0x77]  ;;  %v334_v53 = vunpack.c.l.bf16 %v319_v48  ;;  %v335_v56 = vunpack.c.h.bf16 %v319_v48  ;;  %s2460_s22 = smov (!%p306_p4, %s1982_s22), 1 }
  0x16   : > { %559 = vst [vmem:[#allocation2 + $0xe8] sm:$0x7c] %v547_v5  ;;  %v447_v44 = vrot.slane %v369_v37, 3  ;;  %v318_v51 = vld [vmem:[%s2012_s14 + $0x10] sm:$0x77]  ;;  %v374_v54 = vunpack.c.l.bf16 %v357_v49  ;;  %v375_v61 = vunpack.c.h.bf16 %v357_v49  ;;  %s1851_s23 = sshll.u32 %s2460_s22, 2 }
  0x17   : > { %565 = vst [vmem:[#allocation2 + $0x38] sm:$0x7c] %v547_v5  ;;  %v356_v52 = vld [vmem:[%s2002_s9 + $0x20] sm:$0x77]  ;;  %v332_v55 = vunpack.c.l.bf16 %v318_v51  ;;  %v333_v59 = vunpack.c.h.bf16 %v318_v51  ;;  %v321_v2 = vld [vmem:[%s2012_s14 + $0x28] sm:$0x77]  ;;  %s309_s12 = scalar_lea.vmem %s2453_s5, %s1851_s23 }
  0x18   : > { %496 = vst [vmem:[#allocation2 + $0x58] sm:$0x3] %v442_v11  ;;  %v372_v57 = vunpack.c.l.bf16 %v356_v52  ;;  %v452_v60 = vrot.slane %v374_v54, 3  ;;  %v373_v0 = vunpack.c.h.bf16 %v356_v52  ;;  %v453_v1 = vrot.slane %v375_v61, 3  ;;  %v359_v3 = vld [vmem:[%s2002_s9 + $0x38] sm:$0x77] }
  0x19   : > { %490 = vst [vmem:[#allocation2 + $0x140] sm:$0xe0] %v442_v11  ;;  %v358_v7 = vld [vmem:[%s2002_s9 + $0x30] sm:$0x77]  ;;  %v338_v9 = vunpack.c.l.bf16 %v321_v2  ;;  %v378_v10 = vunpack.c.l.bf16 %v359_v3  ;;  %v339_v14 = vunpack.c.h.bf16 %v321_v2  ;;  %v323_v25 = vld [vmem:[%s2012_s14 + $0x38] sm:$0x77] }
  0x1a   : > { %498 = vst [vmem:[#allocation2 + $0x20] sm:$0x3] %v444_v12  ;;  %v450_v63 = vrot.slane %v372_v57, 3  ;;  %v451_v4 = vrot.slane %v373_v0, 3  ;;  %v376_v15 = vunpack.c.l.bf16 %v358_v7  ;;  %v322_v29 = vld [vmem:[%s2012_s14 + $0x30] sm:$0x77] }
  0x1b   : > { %492 = vst [vmem:[#allocation2 + $0x10] sm:$0xe0] %v444_v12  ;;  %v456_v18 = vrot.slane %v378_v10, 3  ;;  %v340_v36 = vunpack.c.l.bf16 %v322_v29  ;;  %v325_v49 = vld [vmem:[%s2012_s14 + $0x48] sm:$0x77] }
  0x1c   : > { %499 = vst [vmem:[#allocation2 + $0xe8] sm:$0x3] %v445_v13  ;;  %v454_v21 = vrot.slane %v376_v15, 3  ;;  %v363_v51 = vld [vmem:[%s2002_s9 + $0x58] sm:$0x77]  ;;  %v346_v57 = vunpack.c.l.bf16 %v325_v49 }
  0x1d   : > { %493 = vst [vmem:[#allocation2 + $0x78] sm:$0xe0] %v445_v13  ;;  %v327_v10 = vld [vmem:[%s2012_s14 + $0x58] sm:$0x77] }
  0x1e   : > { %571 = vst [vmem:[#allocation2 + $0x8] sm:$0x7c] %v547_v5  ;;  %v350_v15 = vunpack.c.l.bf16 %v327_v10 }
  0x1f   : > { %v2015_v19 = vld [vmem:[#allocation2 + $0x58] sm:$0x7f]  ;;  %577 = vst [vmem:[#allocation2 + $0x60] sm:$0x7c] %v547_v5  ;;  %v320_v5 = vld [vmem:[%s2012_s14 + $0x20] sm:$0x77] }
  0x20   : > { %642 = vmatpush.xpose.msra.mxu0 %v2015_v19  ;;  %497 = vst [vmem:[#allocation2 + $0x98] sm:$0x3] %v443_v16  ;;  %v336_v12 = vunpack.c.l.bf16 %v320_v5 }
  0x21   : > { %v2020_v22 = vld [vmem:[#allocation2 + $0x20] sm:$0x7f]  ;;  %557 = vst [vmem:[#allocation2 + $0x98] sm:$0x7c] %v545_v17 }
  0x22   : > { %688 = vmatpush.xpose.msra.mxu2 %v2020_v22  ;;  %491 = vst [vmem:[#allocation2 + $0x40] sm:$0xe0] %v443_v16 }
  0x23   : > { %v2024_v26 = vld [vmem:[#allocation2 + $0xe8] sm:$0x7f]  ;;  %563 = vst [vmem:[#allocation2 + $0x110] sm:$0x7c] %v545_v17 }
  0x24   : > { %711 = vmatpush.xpose.msra.mxu3 %v2024_v26  ;;  %569 = vst [vmem:[#allocation2 + $0x18] sm:$0x7c] %v545_v17 }
  0x25   : > { %575 = vst [vmem:[#allocation2 + $0xc8] sm:$0x7c] %v545_v17  ;;  %v337_v17 = vunpack.c.h.bf16 %v320_v5 }
  0x26   : > { %394 = vst [vmem:[#allocation2 + $0x140] sm:$0x1f] %v328_v24 }
  0x27   : > { %396 = vst [vmem:[#allocation2 + $0x10] sm:$0x1f] %v330_v27  ;;  %v361_v27 = vld [vmem:[%s2002_s9 + $0x48] sm:$0x77] }
  0x28   : > { %v2030_v33 = vld [vmem:[#allocation2 + $0x98] sm:$0x7f]  ;;  %397 = vst [vmem:[#allocation2 + $0x78] sm:$0x1f] %v331_v28 }
  0x29   : > { %665 = vmatpush.xpose.msra.mxu1 %v2030_v33  ;;  %395 = vst [vmem:[#allocation2 + $0x40] sm:$0x1f] %v329_v30 }
  0x2a   : > { %508 = vst [vmem:[#allocation2 + $0x90] sm:$0x3] %v448_v31 }
  0x2b   : > { %502 = vst [vmem:[#allocation2 + $0x70] sm:$0xe0] %v448_v31  ;;  %v360_v31 = vld [vmem:[%s2002_s9 + $0x40] sm:$0x77] }
  0x2c   : > { %500 = vst [vmem:[#allocation2 + $0x130] sm:$0x3] %v446_v34  ;;  %v380_v39 = vunpack.c.l.bf16 %v360_v31 }
  0x2d   : > { %v580_v38 = vld [vmem:[#allocation2 + $0x140] sm:$0xff]  ;;  %560 = vst [vmem:[#allocation2 + $0x130] sm:$0x7c] %v548_v35 }
  0x2e   : > { %643 = vmatpush.xpose.msra.mxu0 %v580_v38  ;;  %v582_v40 = vld [vmem:[#allocation2 + $0x10] sm:$0xff]  ;;  %494 = vst [vmem:[#allocation2 + $0x160] sm:$0xe0] %v446_v34  ;;  %v382_v34 = vunpack.c.l.bf16 %v361_v27 }
  0x2f   : > { %689 = vmatpush.xpose.msra.mxu2 %v582_v40  ;;  %v583_v42 = vld [vmem:[#allocation2 + $0x78] sm:$0xff]  ;;  %566 = vst [vmem:[#allocation2 + $0x28] sm:$0x7c] %v548_v35 }
  0x30   : > { %712 = vmatpush.xpose.msra.mxu3 %v583_v42  ;;  %v581_v43 = vld [vmem:[#allocation2 + $0x40] sm:$0xff]  ;;  %572 = vst [vmem:[#allocation2] sm:$0x7c] %v548_v35 }
  0x31   : > { %666 = vmatpush.xpose.msra.mxu1 %v581_v43  ;;  %644 = vmatmul.f32.vlgmr.msra.gmra.mxu0 %v580_v38  ;;  %v2036_v46 = vld [vmem:[#allocation2 + $0x90] sm:$0x7f]  ;;  %578 = vst [vmem:[#allocation2 + $0x158] sm:$0x7c] %v548_v35  ;;  %v343_v38 = vunpack.c.h.bf16 %v323_v25 }
  0x32   : > { %690 = vmatmul.f32.vlgmr.msra.gmra.mxu2 %v582_v40  ;;  %509 = vst [vmem:[#allocation2 + $0x110] sm:$0x3] %v449_v41 }
  0x33   : > { %713 = vmatmul.f32.vlgmr.msra.gmra.mxu3 %v583_v42  ;;  %780 = vmatpush.xpose.msrb.mxu2 %v2036_v46  ;;  %503 = vst [vmem:[#allocation2 + $0x178] sm:$0xe0] %v449_v41  ;;  %v341_v41 = vunpack.c.h.bf16 %v322_v29  ;;  %v460_v42 = vrot.slane %v382_v34, 3 }
  0x34   : > { %667 = vmatmul.f32.vlgmr.msra.gmra.mxu1 %v581_v43  ;;  %v2044_v50 = vld [vmem:[#allocation2 + $0x130] sm:$0x7f]  ;;  %501 = vst [vmem:[#allocation2 + $0x170] sm:$0x3] %v447_v44  ;;  %v383_v43 = vunpack.c.h.bf16 %v361_v27 }
  0x35   : > { %734 = vmatpush.xpose.msrb.mxu0 %v2044_v50  ;;  %561 = vst [vmem:[#allocation2 + $0x170] sm:$0x7c] %v549_v45 }
  0x36   : > { %495 = vst [vmem:[#allocation2 + $0xf8] sm:$0xe0] %v447_v44  ;;  %v461_v48 = vrot.slane %v383_v43, 3 }
  0x37   : > { %567 = vst [vmem:[#allocation2 + $0x68] sm:$0x7c] %v549_v45 }
  0x38   : > { %573 = vst [vmem:[#allocation2 + $0xd8] sm:$0x7c] %v549_v45 }
  0x39   : > { %v2049_v58 = vld [vmem:[#allocation2 + $0x110] sm:$0x7f]  ;;  %579 = vst [vmem:[#allocation2 + $0x150] sm:$0x7c] %v549_v45  ;;  %647 = vmatmul.f32.gmra.mxu0 %v2015_v19  ;;  %v379_v19 = vunpack.c.h.bf16 %v359_v3  ;;  %v458_v45 = vrot.slane %v380_v39, 3  ;;  %v387_v3 = vunpack.c.h.bf16 %v363_v51 }
  0x3a   : > { %803 = vmatpush.xpose.msrb.mxu3 %v2049_v58  ;;  %693 = vmatmul.f32.gmra.mxu2 %v2020_v22  ;;  %400 = vst [vmem:[#allocation2 + $0x70] sm:$0x1f] %v334_v53  ;;  %v377_v22 = vunpack.c.h.bf16 %v358_v7  ;;  %v324_v53 = vld [vmem:[%s2012_s14 + $0x40] sm:$0x77] }
  0x3b   : > { %716 = vmatmul.f32.gmra.mxu3 %v2024_v26  ;;  %398 = vst [vmem:[#allocation2 + $0x160] sm:$0x1f] %v332_v55  ;;  %v457_v24 = vrot.slane %v379_v19, 3  ;;  %v362_v55 = vld [vmem:[%s2002_s9 + $0x50] sm:$0x77]  ;;  %v351_v19 = vunpack.c.h.bf16 %v327_v10  ;;  %s2291_s9 = scalar_lea.vmem %s2448_s0, %s1846_s27 }
  0x3c   : > { %v2055_v62 = vld [vmem:[#allocation2 + $0x170] sm:$0x7f]  ;;  %670 = vmatmul.f32.gmra.mxu1 %v2030_v33  ;;  %401 = vst [vmem:[#allocation2 + $0x178] sm:$0x1f] %v335_v56  ;;  %v455_v28 = vrot.slane %v377_v22, 3  ;;  %v342_v33 = vunpack.c.l.bf16 %v323_v25 }
  0x3d   : > { %757 = vmatpush.xpose.msrb.mxu1 %v2055_v62  ;;  %399 = vst [vmem:[#allocation2 + $0xf8] sm:$0x1f] %v333_v59 }
  0x3e   : > { %512 = vst [vmem:[#allocation2 + $0x28] sm:$0x3] %v452_v60 }
  0x3f   : > { %506 = vst [vmem:[#allocation2 + $0x120] sm:$0xe0] %v452_v60  ;;  %v344_v60 = vunpack.c.l.bf16 %v324_v53 }
  0x40   : > { %510 = vst [vmem:[#allocation2 + $0xc0] sm:$0x3] %v450_v63 }
  0x41   : > { %v592_v6 = vld [vmem:[#allocation2 + $0x70] sm:$0xff]  ;;  %504 = vst [vmem:[#allocation2 + $0xa8] sm:$0xe0] %v450_v63  ;;  %v384_v63 = vunpack.c.l.bf16 %v362_v55 }
  0x42   : > { %781 = vmatpush.xpose.msrb.mxu2 %v592_v6  ;;  %v584_v8 = vld [vmem:[#allocation2 + $0x160] sm:$0xff]  ;;  %513 = vst [vmem:[#allocation2 + $0x68] sm:$0x3] %v453_v1 }
  0x43   : > { %735 = vmatpush.xpose.msrb.mxu0 %v584_v8  ;;  %v593_v11 = vld [vmem:[#allocation2 + $0x178] sm:$0xff]  ;;  %507 = vst [vmem:[#allocation2 + $0xb8] sm:$0xe0] %v453_v1  ;;  %v345_v1 = vunpack.c.h.bf16 %v324_v53  ;;  %v462_v5 = vrot.slane %v384_v63, 3 }
  0x44   : > { %804 = vmatpush.xpose.msrb.mxu3 %v593_v11  ;;  %v585_v13 = vld [vmem:[#allocation2 + $0xf8] sm:$0xff]  ;;  %511 = vst [vmem:[#allocation2 + $0x38] sm:$0x3] %v451_v4 }
  0x45   : > { %758 = vmatpush.xpose.msrb.mxu1 %v585_v13  ;;  %782 = vmatmul.f32.vlgmr.msrb.gmra.mxu2 %v592_v6  ;;  %v2063_v16 = vld [vmem:[#allocation2 + $0x28] sm:$0x7f]  ;;  %505 = vst [vmem:[#allocation2 + $0xb0] sm:$0xe0] %v451_v4  ;;  %v385_v6 = vunpack.c.h.bf16 %v362_v55 }
  0x46   : > { %736 = vmatmul.f32.vlgmr.msrb.gmra.mxu0 %v584_v8  ;;  %872 = vmatpush.xpose.msra.mxu2 %v2063_v16  ;;  %404 = vst [vmem:[#allocation2 + $0x120] sm:$0x1f] %v338_v9  ;;  %v465_v8 = vrot.slane %v387_v3, 3 }
  0x47   : > { %805 = vmatmul.f32.vlgmr.msrb.gmra.mxu3 %v593_v11  ;;  %v2066_v20 = vld [vmem:[#allocation2 + $0xc0] sm:$0x7f]  ;;  %402 = vst [vmem:[#allocation2 + $0xa8] sm:$0x1f] %v336_v12  ;;  %v463_v11 = vrot.slane %v385_v6, 3 }
  0x48   : > { %759 = vmatmul.f32.vlgmr.msrb.gmra.mxu1 %v585_v13  ;;  %826 = vmatpush.xpose.msra.mxu0 %v2066_v20  ;;  %405 = vst [vmem:[#allocation2 + $0xb8] sm:$0x1f] %v339_v14  ;;  %v326_v12 = vld [vmem:[%s2012_s14 + $0x50] sm:$0x77] }
  0x49   : > { %v2069_v23 = vld [vmem:[#allocation2 + $0x68] sm:$0x7f]  ;;  %403 = vst [vmem:[#allocation2 + $0xb0] sm:$0x1f] %v337_v17  ;;  %v348_v17 = vunpack.c.l.bf16 %v326_v12 }
  0x4a   : > { %895 = vmatpush.xpose.msra.mxu3 %v2069_v23  ;;  %522 = vst [vmem:[#allocation2 + $0x128] sm:$0x3] %v456_v18 }
  0x4b   : > { %v2073_v26 = vld [vmem:[#allocation2 + $0x38] sm:$0x7f]  ;;  %516 = vst [vmem:[#allocation2 + $0x88] sm:$0xe0] %v456_v18 }
  0x4c   : > { %849 = vmatpush.xpose.msra.mxu1 %v2073_v26  ;;  %520 = vst [vmem:[#allocation2 + $0x30] sm:$0x3] %v454_v21 }
  0x4d   : > { %785 = vmatmul.f32.gmra.mxu2 %v2036_v46  ;;  %v596_v30 = vld [vmem:[#allocation2 + $0x120] sm:$0xff]  ;;  %514 = vst [vmem:[#allocation2 + $0x118] sm:$0xe0] %v454_v21  ;;  %v381_v46 = vunpack.c.h.bf16 %v360_v31  ;;  %v349_v21 = vunpack.c.h.bf16 %v326_v12 }
  0x4e   : > { %739 = vmatmul.f32.gmra.mxu0 %v2044_v50  ;;  %873 = vmatpush.xpose.msra.mxu2 %v596_v30  ;;  %v594_v32 = vld [vmem:[#allocation2 + $0xa8] sm:$0xff]  ;;  %523 = vst [vmem:[#allocation2 + $0x8] sm:$0x3] %v457_v24 }
  0x4f   : > { %808 = vmatmul.f32.gmra.mxu3 %v2049_v58  ;;  %827 = vmatpush.xpose.msra.mxu0 %v594_v32  ;;  %v597_v35 = vld [vmem:[#allocation2 + $0xb8] sm:$0xff]  ;;  %517 = vst [vmem:[#allocation2 + $0x48] sm:$0xe0] %v457_v24  ;;  %v459_v52 = vrot.slane %v381_v46, 3  ;;  %v386_v58 = vunpack.c.l.bf16 %v363_v51 }
  0x50   : > { %762 = vmatmul.f32.gmra.mxu1 %v2055_v62  ;;  %896 = vmatpush.xpose.msra.mxu3 %v597_v35  ;;  %v595_v37 = vld [vmem:[#allocation2 + $0xb0] sm:$0xff]  ;;  %521 = vst [vmem:[#allocation2 + $0x18] sm:$0x3] %v455_v28  ;;  %v347_v62 = vunpack.c.h.bf16 %v325_v49 }
  0x51   : > { %850 = vmatpush.xpose.msra.mxu1 %v595_v37  ;;  %v2083_v40 = vld [vmem:[#allocation2 + $0x128] sm:$0x7f]  ;;  %515 = vst [vmem:[#allocation2 + $0xa0] sm:$0xe0] %v455_v28  ;;  %v464_v2 = vrot.slane %v386_v58, 3 }
  0x52   : > { %964 = vmatpush.xpose.msrb.mxu2 %v2083_v40  ;;  %408 = vst [vmem:[#allocation2 + $0x88] sm:$0x1f] %v342_v33 }
  0x53   : > { %v2086_v44 = vld [vmem:[#allocation2 + $0x30] sm:$0x7f]  ;;  %406 = vst [vmem:[#allocation2 + $0x118] sm:$0x1f] %v340_v36  ;;  %v1190_v36 = vlaneseq }
  0x54   : > { %918 = vmatpush.xpose.msrb.mxu0 %v2086_v44  ;;  %409 = vst [vmem:[#allocation2 + $0x48] sm:$0x1f] %v343_v38 }
  0x55   : > { %874 = vmatmul.f32.vlgmr.msra.gmra.mxu2 %v596_v30  ;;  %v2089_v47 = vld [vmem:[#allocation2 + $0x8] sm:$0x7f]  ;;  %407 = vst [vmem:[#allocation2 + $0xa0] sm:$0x1f] %v341_v41  ;;  %v2117_v41 = vand.u32 127, %v1190_v36 }
  0x56   : > { %828 = vmatmul.f32.vlgmr.msra.gmra.mxu0 %v594_v32  ;;  %987 = vmatpush.xpose.msrb.mxu3 %v2089_v47  ;;  %532 = vst [vmem:[#allocation2 + $0x80] sm:$0x3] %v460_v42 }
  0x57   : > { %897 = vmatmul.f32.vlgmr.msra.gmra.mxu3 %v597_v35  ;;  %v2093_v50 = vld [vmem:[#allocation2 + $0x18] sm:$0x7f]  ;;  %526 = vst [vmem:[#allocation2 + $0x108] sm:$0xe0] %v460_v42 }
  0x58   : > { %851 = vmatmul.f32.vlgmr.msra.gmra.mxu1 %v595_v37  ;;  %524 = vst [vmem:[#allocation2] sm:$0x3] %v458_v45 }
  0x59   : > { %941 = vmatpush.xpose.msrb.mxu1 %v2093_v50  ;;  %v606_v54 = vld [vmem:[#allocation2 + $0x88] sm:$0xff]  ;;  %518 = vst [vmem:[#allocation2 + $0xe0] sm:$0xe0] %v458_v45 }
  0x5a   : > { %965 = vmatpush.xpose.msrb.mxu2 %v606_v54  ;;  %v604_v56 = vld [vmem:[#allocation2 + $0x118] sm:$0xff]  ;;  %533 = vst [vmem:[#allocation2 + $0xc8] sm:$0x3] %v461_v48 }
  0x5b   : > { %919 = vmatpush.xpose.msrb.mxu0 %v604_v56  ;;  %v607_v59 = vld [vmem:[#allocation2 + $0x48] sm:$0xff]  ;;  %527 = vst [vmem:[#allocation2 + $0xf0] sm:$0xe0] %v461_v48 }
  0x5c   : > { %988 = vmatpush.xpose.msrb.mxu3 %v607_v59  ;;  %v605_v61 = vld [vmem:[#allocation2 + $0xa0] sm:$0xff]  ;;  %525 = vst [vmem:[#allocation2 + $0xd8] sm:$0x3] %v459_v52 }
  0x5d   : > { %877 = vmatmul.f32.gmra.mxu2 %v2063_v16  ;;  %942 = vmatpush.xpose.msrb.mxu1 %v605_v61  ;;  %v2100_v0 = vld [vmem:[#allocation2 + $0x80] sm:$0x7f]  ;;  %519 = vst [vmem:[#allocation2 + $0x100] sm:$0xe0] %v459_v52 }
  0x5e   : > { %831 = vmatmul.f32.gmra.mxu0 %v2066_v20  ;;  %1056 = vmatpush.xpose.msra.mxu2 %v2100_v0  ;;  %412 = vst [vmem:[#allocation2 + $0x108] sm:$0x1f] %v346_v57 }
  0x5f   : > { %900 = vmatmul.f32.gmra.mxu3 %v2069_v23  ;;  %v2105_v4 = vld [vmem:[#allocation2] sm:$0x7f]  ;;  %410 = vst [vmem:[#allocation2 + $0xe0] sm:$0x1f] %v344_v60 }
  0x60   : > { %854 = vmatmul.f32.gmra.mxu1 %v2073_v26  ;;  %1010 = vmatpush.xpose.msra.mxu0 %v2105_v4  ;;  %413 = vst [vmem:[#allocation2 + $0xf0] sm:$0x1f] %v347_v62 }
  0x61   : > { %v623_v7 = vld [vmem:[#allocation2 + $0xc8] sm:$0x7f]  ;;  %411 = vst [vmem:[#allocation2 + $0x100] sm:$0x1f] %v345_v1 }
  0x62   : > { %1079 = vmatpush.xpose.msra.mxu3 %v623_v7  ;;  %536 = vst [vmem:[#allocation2 + $0x158] sm:$0x3] %v464_v2 }
  0x63   : > { %v615_v9 = vld [vmem:[#allocation2 + $0xd8] sm:$0x7f]  ;;  %530 = vst [vmem:[#allocation2 + $0x148] sm:$0xe0] %v464_v2 }
  0x64   : > { %1033 = vmatpush.xpose.msra.mxu1 %v615_v9  ;;  %534 = vst [vmem:[#allocation2 + $0xd0] sm:$0x3] %v462_v5 }
  0x65   : > { %966 = vmatmul.f32.vlgmr.msrb.gmra.mxu2 %v606_v54  ;;  %v616_v13 = vld [vmem:[#allocation2 + $0x108] sm:$0xff]  ;;  %528 = vst [vmem:[#allocation2 + $0x50] sm:$0xe0] %v462_v5 }
  0x66   : > { %920 = vmatmul.f32.vlgmr.msrb.gmra.mxu0 %v604_v56  ;;  %1057 = vmatpush.xpose.msra.mxu2 %v616_v13  ;;  %v608_v14 = vld [vmem:[#allocation2 + $0xe0] sm:$0xff]  ;;  %537 = vst [vmem:[#allocation2 + $0x150] sm:$0x3] %v465_v8 }
  0x67   : > { %989 = vmatmul.f32.vlgmr.msrb.gmra.mxu3 %v607_v59  ;;  %1011 = vmatpush.xpose.msra.mxu0 %v608_v14  ;;  %v617_v16 = vld [vmem:[#allocation2 + $0xf0] sm:$0xff]  ;;  %531 = vst [vmem:[#allocation2 + $0x168] sm:$0xe0] %v465_v8 }
  0x68   : > { %943 = vmatmul.f32.vlgmr.msrb.gmra.mxu1 %v605_v61  ;;  %1080 = vmatpush.xpose.msra.mxu3 %v617_v16  ;;  %v609_v18 = vld [vmem:[#allocation2 + $0x100] sm:$0xff]  ;;  %535 = vst [vmem:[#allocation2 + $0x60] sm:$0x3] %v463_v11 }
  0x69   : > { %1034 = vmatpush.xpose.msra.mxu1 %v609_v18  ;;  %v626_v20 = vld [vmem:[#allocation2 + $0x158] sm:$0x7f]  ;;  %529 = vst [vmem:[#allocation2 + $0x138] sm:$0xe0] %v463_v11 }
  0x6a   : > { %1148 = vmatpush.xpose.msrb.mxu2 %v626_v20  ;;  %416 = vst [vmem:[#allocation2 + $0x148] sm:$0x1f] %v350_v15 }
  0x6b   : > { %v624_v22 = vld [vmem:[#allocation2 + $0xd0] sm:$0x7f]  ;;  %414 = vst [vmem:[#allocation2 + $0x50] sm:$0x1f] %v348_v17 }
  0x6c   : > { %1102 = vmatpush.xpose.msrb.mxu0 %v624_v22  ;;  %417 = vst [vmem:[#allocation2 + $0x168] sm:$0x1f] %v351_v19 }
  0x6d   : > { %969 = vmatmul.f32.gmra.mxu2 %v2083_v40  ;;  %v627_v23 = vld [vmem:[#allocation2 + $0x150] sm:$0x7f]  ;;  %415 = vst [vmem:[#allocation2 + $0x138] sm:$0x1f] %v349_v21  ;;  %v1191_v40 = vshrl.u32 %v1190_v36, 7 }
  0x6e   : > { %923 = vmatmul.f32.gmra.mxu0 %v2086_v44  ;;  %1171 = vmatpush.xpose.msrb.mxu3 %v627_v23 }
  0x6f   : > { %992 = vmatmul.f32.gmra.mxu3 %v2089_v47  ;;  %v625_v24 = vld [vmem:[#allocation2 + $0x60] sm:$0x7f]  ;;  %vm2120_vm0 = vcmp.eq.s32.totalorder %v1191_v40, %v2117_v41 }
  0x70   : > { %946 = vmatmul.f32.gmra.mxu1 %v2093_v50 }
  0x71   : > { %1125 = vmatpush.xpose.msrb.mxu1 %v625_v24  ;;  %v620_v25 = vld [vmem:[#allocation2 + $0x148] sm:$0xff] }
  0x72   : > { %1149 = vmatpush.xpose.msrb.mxu2 %v620_v25  ;;  %v618_v26 = vld [vmem:[#allocation2 + $0x50] sm:$0xff] }
  0x73   : > { %1103 = vmatpush.xpose.msrb.mxu0 %v618_v26  ;;  %v621_v27 = vld [vmem:[#allocation2 + $0x168] sm:$0xff] }
  0x74   : > { %1172 = vmatpush.xpose.msrb.mxu3 %v621_v27  ;;  %v619_v28 = vld [vmem:[#allocation2 + $0x138] sm:$0xff] }
  0x75   : > { %1058 = vmatmul.f32.vlgmr.msra.gmra.mxu2 %v616_v13  ;;  %1126 = vmatpush.xpose.msrb.mxu1 %v619_v28 }
  0x76   : > { %1012 = vmatmul.f32.vlgmr.msra.gmra.mxu0 %v608_v14 }
  0x77   : > { %1081 = vmatmul.f32.vlgmr.msra.gmra.mxu3 %v617_v16 }
  0x78   : > { %1035 = vmatmul.f32.vlgmr.msra.gmra.mxu1 %v609_v18 }
  0x7d   : > { %1061 = vmatmul.f32.gmra.mxu2 %v2100_v0 }
  0x7e   : > { %1015 = vmatmul.f32.gmra.mxu0 %v2105_v4 }
  0x7f   : > { %1084 = vmatmul.f32.gmra.mxu3 %v623_v7 }
  0x80   : > { %1038 = vmatmul.f32.gmra.mxu1 %v615_v9 }
  0x85   : > { %1150 = vmatmul.f32.vlgmr.msrb.gmra.mxu2 %v620_v25 }
  0x86   : > { %1104 = vmatmul.f32.vlgmr.msrb.gmra.mxu0 %v618_v26  ;;  %v2132_v54 = vpop.permute.xlu0 %1183 }
  0x87   : > { %1173 = vmatmul.f32.vlgmr.msrb.gmra.mxu3 %v621_v27 }
  0x88   : > { %1127 = vmatmul.f32.vlgmr.msrb.gmra.mxu1 %v619_v28 }
  0x8d   : > { %1153 = vmatmul.f32.gmra.mxu2 %v626_v20 }
  0x8e   : > { %1107 = vmatmul.f32.gmra.mxu0 %v624_v22 }
  0x8f   : > { %1176 = vmatmul.f32.gmra.mxu3 %v627_v23 }
  0x90   : > { %1130 = vmatmul.f32.gmra.mxu1 %v625_v24 }
  0xae   : > { %v645_v29 = vpop.f32.mrf.mxu0 }
  0xb1   : > { %v668_v30 = vpop.f32.mrf.mxu1 }
  0xb2   : > { %v669_v35 = vadd.f32 %v668_v30, %v645_v29 }
  0xb5   : > { %v691_v31 = vpop.f32.mrf.mxu2 }
  0xb6   : > { %v714_v32 = vpop.f32.mrf.mxu3  ;;  %v648_v33 = vpop.f32.mrf.mxu0  ;;  %v692_v37 = vadd.f32 %v691_v31, %v669_v35 }
  0xb8   : > { %v715_v42 = vadd.f32 %v714_v32, %v692_v37 }
  0xb9   : > { %v671_v34 = vpop.f32.mrf.mxu1 }
  0xba   : > { %v672_v44 = vadd.f32 %v671_v34, %v648_v33 }
  0xbd   : > { %v694_v38 = vpop.f32.mrf.mxu2 }
  0xbe   : > { %v717_v39 = vpop.f32.mrf.mxu3  ;;  %v695_v48 = vadd.f32 %v694_v38, %v672_v44 }
  0xc0   : > { %v718_v53 = vadd.f32 %v717_v39, %v695_v48 }
  0xc3   : > { %v737_v43 = vpop.f32.mrf.mxu0 }
  0xc4   : > { %v738_v45 = vadd.f32 %v737_v43, %v715_v42 }
  0xc5   : > { %v760_v46 = vpop.f32.mrf.mxu1 }
  0xc6   : > { %v2124_v49 = vadd.f32 %v760_v46, %v738_v45 }
  0xc8   : > { %v783_v50 = vpop.f32.mrf.mxu2  ;;  %v1197_v51 = vsel %vm2120_vm0, %v2124_v49, 0.0  ;;  %v2137_v59 = vadd.f32 %v2132_v54, %v2124_v49  ;;  %v1247_v63 = vrot.slane %v2124_v49, 5 }
  0xc9   : > { %v2130_v52 = vsel %vm1201_vm1, %v1197_v51, 0.0 }
  0xca   : > { %v806_v55 = vpop.f32.mrf.mxu3  ;;  %1230 = vadd.xlane.f32.xlu2 %v2130_v52  ;;  %v1504_v0 = vsel %vm1503_vm2, %v2137_v59, -inf }
  0xcb   : > { %v740_v56 = vpop.f32.mrf.mxu0  ;;  %v807_v1 = vadd.f32 %v806_v55, %v783_v50 }
  0xcc   : > { %v741_v57 = vadd.f32 %v740_v56, %v718_v53 }
  0xcd   : > { %v763_v58 = vpop.f32.mrf.mxu1 }
  0xce   : > { %v2139_v60 = vadd.f32 %v763_v58, %v741_v57 }
  0xd0   : > { %v1248_v61 = vrot.slane %v2139_v60, 5  ;;  %v786_v62 = vpop.f32.mrf.mxu2 }
  0xd2   : > { %v809_v2 = vpop.f32.mrf.mxu3  ;;  %1505 = vmax.xlane.f32.xlu2 %v1504_v0  ;;  %v1249_v3 = vsel %vm1246_vm3, %v1247_v63, %v1248_v61 }
  0xd3   : > { %v829_v4 = vpop.f32.mrf.mxu0  ;;  %1259 = vrot.lane.b32.xlu0 %v1249_v3, %s1936_s25  ;;  %v810_v18 = vadd.f32 %v809_v2, %v786_v62 }
  0xd4   : > { %v830_v5 = vadd.f32 %v829_v4, %v807_v1 }
  0xd5   : > { %v852_v6 = vpop.f32.mrf.mxu1 }
  0xd6   : > { %v853_v7 = vadd.f32 %v852_v6, %v830_v5 }
  0xd8   : > { %v875_v8 = vpop.f32.mrf.mxu2 }
  0xd9   : > { %v876_v9 = vadd.f32 %v875_v8, %v853_v7 }
  0xda   : > { %v898_v10 = vpop.f32.mrf.mxu3 }
  0xdb   : > { %v832_v11 = vpop.f32.mrf.mxu0  ;;  %v2147_v12 = vadd.f32 %v898_v10, %v876_v9 }
  0xdc   : > { %v833_v20 = vadd.f32 %v832_v11, %v810_v18 }
  0xdd   : > { %v855_v13 = vpop.f32.mrf.mxu1  ;;  %v1198_v14 = vsel %vm2120_vm0, %v2147_v12, 0.0  ;;  %v1250_v37 = vrot.slane %v2147_v12, 5  ;;  %v2164_v40 = vadd.f32 %v2132_v54, %v2147_v12 }
  0xde   : > { %v2153_v15 = vsel %vm1201_vm1, %v1198_v14, 0.0  ;;  %v856_v23 = vadd.f32 %v855_v13, %v833_v20 }
  0xdf   : > { %1232 = vadd.xlane.f32.xlu1 %v2153_v15  ;;  %v1507_v45 = vsel %vm1503_vm2, %v2164_v40, -inf }
  0xe0   : > { %v878_v16 = vpop.f32.mrf.mxu2 }
  0xe1   : > { %v879_v25 = vadd.f32 %v878_v16, %v856_v23 }
  0xe2   : > { %v901_v17 = vpop.f32.mrf.mxu3 }
  0xe3   : > { %v921_v19 = vpop.f32.mrf.mxu0  ;;  %v2156_v29 = vadd.f32 %v901_v17, %v879_v25 }
  0xe5   : > { %v944_v21 = vpop.f32.mrf.mxu1  ;;  %v1251_v33 = vrot.slane %v2156_v29, 5 }
  0xe6   : > { %v945_v27 = vadd.f32 %v944_v21, %v921_v19 }
  0xe7   : > { %v1252_v38 = vsel %vm1246_vm3, %v1250_v37, %v1251_v33 }
  0xe8   : > { %v967_v22 = vpop.f32.mrf.mxu2 }
  0xe9   : > { %v968_v31 = vadd.f32 %v967_v22, %v945_v27 }
  0xea   : > { %v990_v24 = vpop.f32.mrf.mxu3 }
  0xeb   : > { %v924_v26 = vpop.f32.mrf.mxu0  ;;  %v991_v35 = vadd.f32 %v990_v24, %v968_v31 }
  0xed   : > { %v947_v28 = vpop.f32.mrf.mxu1 }
  0xee   : > { %v948_v17 = vadd.f32 %v947_v28, %v924_v26 }
  0xf0   : > { %v970_v30 = vpop.f32.mrf.mxu2 }
  0xf1   : > { %v971_v20 = vadd.f32 %v970_v30, %v948_v17  ;;  %v2254_v17 = vmul.f32 2.0, %v2124_v49 }
  0xf2   : > { %v993_v32 = vpop.f32.mrf.mxu3 }
  0xf3   : > { %v1013_v34 = vpop.f32.mrf.mxu0  ;;  %v994_v22 = vadd.f32 %v993_v32, %v971_v20 }
  0xf4   : > { %v1014_v42 = vadd.f32 %v1013_v34, %v991_v35 }
  0xf5   : > { %v1036_v36 = vpop.f32.mrf.mxu1 }
  0xf6   : > { %v2168_v46 = vadd.f32 %v1036_v36, %v1014_v42 }
  0xf8   : > { %v1059_v39 = vpop.f32.mrf.mxu2  ;;  %1261 = vrot.lane.b32.xlu1 %v1252_v38, %s1936_s25  ;;  %v1199_v50 = vsel %vm2120_vm0, %v2168_v46, 0.0  ;;  %v1188_v11 = vadd.f32 %v2132_v54, %v2168_v46  ;;  %v1253_v28 = vrot.slane %v2168_v46, 5 }
  0xf9   : > { %v2174_v56 = vsel %vm1201_vm1, %v1199_v50, 0.0 }
  0xfa   : > { %v1082_v43 = vpop.f32.mrf.mxu3  ;;  %v1510_v16 = vsel %vm1503_vm2, %v1188_v11, -inf }
  0xfb   : > { %v1016_v44 = vpop.f32.mrf.mxu0  ;;  %v1083_v51 = vadd.f32 %v1082_v43, %v1059_v39 }
  0xfc   : > { %v1017_v25 = vadd.f32 %v1016_v44, %v994_v22 }
  0xfd   : > { %1508 = vmax.xlane.f32.xlu0 %v1507_v45  ;;  %v1039_v48 = vpop.f32.mrf.mxu1 }
 0x100   : > { %v1062_v53 = vpop.f32.mrf.mxu2 }
 0x102   : > { %v1085_v55 = vpop.f32.mrf.mxu3 }
 0x103   : > { %v1105_v57 = vpop.f32.mrf.mxu0  ;;  %v1086_v6 = vadd.f32 %v1085_v55, %v1062_v53 }
 0x104   : > { %v1106_v58 = vadd.f32 %v1105_v57, %v1083_v51 }
 0x105   : > { %1234 = vadd.xlane.f32.xlu0 %v2174_v56  ;;  %v1128_v61 = vpop.f32.mrf.mxu1 }
 0x106   : > { %v1129_v62 = vadd.f32 %v1128_v61, %v1106_v58 }
 0x108   : > { %v1151_v63 = vpop.f32.mrf.mxu2 }
 0x109   : > { %v1152_v0 = vadd.f32 %v1151_v63, %v1129_v62 }
 0x10a   : > { %v1174_v1 = vpop.f32.mrf.mxu3 }
 0x10b   : > { %v2177_v2 = vadd.f32 %v1174_v1, %v1152_v0  ;;  %v1108_v8 = vpop.f32.mrf.mxu0 }
 0x10c   : > { %v1109_v9 = vadd.f32 %v1108_v8, %v1086_v6 }
 0x10d   : > { %v1200_v3 = vsel %vm2120_vm0, %v2177_v2, 0.0  ;;  %v1189_v5 = vadd.f32 %v2132_v54, %v2177_v2  ;;  %v1131_v10 = vpop.f32.mrf.mxu1  ;;  %v1256_v24 = vrot.slane %v2177_v2, 5  ;;  %v2198_v54 = vadd.f32 %v1039_v48, %v1017_v25 }
 0x10e   : > { %v2183_v4 = vsel %vm1201_vm1, %v1200_v3, 0.0  ;;  %v1132_v13 = vadd.f32 %v1131_v10, %v1109_v9 }
 0x10f   : > { %1236 = vadd.xlane.f32.xlu2 %v2183_v4  ;;  %v1513_v7 = vsel %vm1503_vm2, %v1189_v5, -inf  ;;  %v1254_v26 = vrot.slane %v2198_v54, 5 }
 0x110   : > { %v1154_v14 = vpop.f32.mrf.mxu2 }
 0x111   : > { %v1155_v18 = vadd.f32 %v1154_v14, %v1132_v13  ;;  %v1255_v30 = vsel %vm1246_vm3, %v1253_v28, %v1254_v26  ;;  %v1210_v28 = vrot.slane %v2153_v15, 4 }
 0x112   : > { %v1177_v19 = vpop.f32.mrf.mxu3 }
 0x113   : > { %v2192_v21 = vadd.f32 %v1177_v19, %v1155_v18  ;;  %v1938_v18 = vmov 0.0  }
 0x114   : > { %1383 = vst [vmem:[%s2248_s30] sm:$0x1f] %v1938_v18 }
 0x115   : > { %v1257_v23 = vrot.slane %v2192_v21, 5  ;;  %1384 = vst [vmem:[%s2248_s30 + $0x8] sm:$0x1f] %v1938_v18 }
 0x116   : > { %1385 = vst [vmem:[%s2248_s30 + $0x10] sm:$0x1f] %v1938_v18 }
 0x117   : > { %1514 = vmax.xlane.f32.xlu2 %v1513_v7  ;;  %v1258_v27 = vsel %vm1246_vm3, %v1256_v24, %v1257_v23  ;;  %1386 = vst [vmem:[%s2248_s30 + $0x18] sm:$0x1f] %v1938_v18 }
 0x122   : > { %1511 = vmax.xlane.f32.xlu1 %v1510_v16 }
 0x12f   : > { %1265 = vrot.lane.b32.xlu2 %v1258_v27, %s1936_s25 }
 0x13b   : > { %1263 = vrot.lane.b32.xlu1 %v1255_v30, %s1936_s25 }
 0x13d   : > { %v2204_v31 = vpop.xlane.xlu2 %1230 }
 0x145   : > { %v1506_v32 = vpop.xlane.xlu2 %1505  ;;  %v1260_v36 = vpop.permute.xlu0 %1259 }
 0x146   : > { %v2207_v33 = vsub.f32 %v2137_v59, %v1506_v32  ;;  %v1271_v37 = vsel %vm2120_vm0, %v1260_v36, 0.0 }
 0x147   : > { %v1275_v38 = vsel %vm1201_vm1, %v1271_v37, 0.0 }
 0x148   : > { %v1520_v34 = vmul.f32 1.442695, %v2207_v33 }
 0x14a   : > { %1875 = vpow2.f32 %v1520_v34  ;;  %v1211_v34 = vadd.f32 %v1210_v28, %v2153_v15  ;;  %v1441_v28 = vld [vmem:[%s2291_s9 + $0x10] sm:$0x1f] }
 0x14c   : > { %v1212_v37 = vrot.slane %v1211_v34, 2 }
 0x150   : > { %v1876_v35 = vpop.eup %1875 }
 0x151   : > { %1532 = vrot.lane.b32.xlu0 %v1876_v35, %s1937_s26 }
 0x152   : > { %v2214_v39 = vpop.xlane.xlu1 %1232 }
 0x158   : > { %1276 = vadd.xlane.f32.xlu2 %v1275_v38 }
 0x16a   : > { %v1262_v44 = vpop.permute.xlu1 %1261 }
 0x16b   : > { %v1272_v45 = vsel %vm2120_vm0, %v1262_v44, 0.0  ;;  %v1213_v44 = vadd.f32 %v1212_v37, %v1211_v34  ;;  %v1296_v34 = vmul.f32 2.0, %v2198_v54  ;;  %v1439_v37 = vld [vmem:[%s2291_s9] sm:$0x1f] }
 0x16c   : > { %v1278_v48 = vsel %vm1201_vm1, %v1272_v45, 0.0 }
 0x170   : > { %v1509_v42 = vpop.xlane.xlu0 %1508 }
 0x171   : > { %v2217_v59 = vsub.f32 %v2164_v40, %v1509_v42 }
 0x173   : > { %v1522_v43 = vmul.f32 1.442695, %v2217_v59 }
 0x175   : > { %1877 = vpow2.f32 %v1522_v43 }
 0x178   : > { %v2239_v7 = vpop.xlane.xlu0 %1234 }
 0x17b   : > { %v1878_v50 = vpop.eup %1877  ;;  %1279 = vadd.xlane.f32.xlu0 %v1278_v48 }
 0x17c   : > { %1534 = vrot.lane.b32.xlu1 %v1878_v50, %s1937_s26 }
 0x182   : > { %v2224_v51 = vpop.xlane.xlu2 %1236 }
 0x18a   : > { %v1515_v53 = vpop.xlane.xlu2 %1514 }
 0x18b   : > { %v2226_v55 = vsub.f32 %v1189_v5, %v1515_v53  ;;  %v1203_v5 = vrot.slane %v2130_v52, 4  ;;  %v1294_v53 = vmul.f32 2.0, %v2156_v29 }
 0x18d   : > { %v1526_v40 = vmul.f32 1.442695, %v2226_v55  ;;  %v1204_v6 = vadd.f32 %v1203_v5, %v2130_v52  ;;  %v1292_v52 = vmul.f32 2.0, %v2139_v60  ;;  %v1307_v60 = vrot.slane %v2254_v17, 5 }
 0x18f   : > { %1879 = vpow2.f32 %v1526_v40  ;;  %v1205_v8 = vrot.slane %v1204_v6, 2  ;;  %v1308_v19 = vrot.slane %v1292_v52, 5  ;;  %v1214_v40 = vrot.slane %v1213_v44, 1 }
 0x191   : > { %v1206_v9 = vadd.f32 %v1205_v8, %v1204_v6  ;;  %v1309_v25 = vsel %vm1246_vm3, %v1307_v60, %v1308_v19  ;;  %v1440_v19 = vld [vmem:[%s2291_s9 + $0x8] sm:$0x1f] }
 0x192   : > { %v1266_v10 = vpop.permute.xlu2 %1265 }
 0x193   : > { %v1207_v14 = vrot.slane %v1206_v9, 1  ;;  %v1274_v16 = vsel %vm2120_vm0, %v1266_v10, 0.0 }
 0x194   : > { %v1284_v20 = vsel %vm1201_vm1, %v1274_v16, 0.0 }
 0x195   : > { %v1880_v57 = vpop.eup %1879  ;;  %v1512_v58 = vpop.xlane.xlu1 %1511  ;;  %v2260_v22 = vadd.f32 %v1207_v14, %v1206_v9 }
 0x196   : > { %v2229_v61 = vsub.f32 %v1188_v11, %v1512_v58  ;;  %1538 = vrot.lane.b32.xlu0 %v1880_v57, %s1937_s26  ;;  %v2277_v57 = vmul.f32 2.0, %v2147_v12  ;;  %v1311_v58 = vrot.slane %v1294_v53, 5  ;;  %v1224_v53 = vrot.slane %v2183_v4, 4 }
 0x198   : > { %v1524_v62 = vmul.f32 1.442695, %v2229_v61 }
 0x19a   : > { %1881 = vpow2.f32 %v1524_v62  ;;  %v2279_v62 = vadd.f32 %v1214_v40, %v1213_v44 }
 0x1a0   : > { %v1882_v63 = vpop.eup %1881 }
 0x1a1   : > { %1536 = vrot.lane.b32.xlu2 %v1882_v63, %s1937_s26  ;;  %v1310_v63 = vrot.slane %v2277_v57, 5 }
 0x1a3   : > { %v1312_v12 = vsel %vm1246_vm3, %v1310_v63, %v1311_v58 }
 0x1ad   : > { %v1264_v0 = vpop.permute.xlu1 %1263 }
 0x1ae   : > { %v1273_v1 = vsel %vm2120_vm0, %v1264_v0, 0.0 }
 0x1af   : > { %v1281_v3 = vsel %vm1201_vm1, %v1273_v1, 0.0 }
 0x1b0   : > { %1282 = vadd.xlane.f32.xlu1 %v1281_v3  ;;  %v1939_v3 = vmov 0  }
 0x1b1   : > { %1872 = vset.pattern.permute.xlu2 %v1939_v3  ;;  %1871 = vset.pattern.permute.xlu0 %v1939_v3 }
 0x1b2   : > { %1873 = vset.pattern.permute.xlu1 %v1939_v3  ;;  %v1298_v3 = vmul.f32 2.0, %v2192_v21 }
 0x1c3   : > { %v1533_v11 = vpop.permute.xlu0 %1532 }
 0x1c4   : > { %v1544_v13 = vsel %vm1201_vm1, %v1533_v11, 0.0 }
 0x1c5   : > { %1545 = vadd.xlane.f32.xlu0 %v1544_v13 }
 0x1ca   : > { %1285 = vadd.xlane.f32.xlu2 %v1284_v20 }
 0x1cb   : > { %v1277_v23 = vpop.xlane.xlu2 %1276 }
 0x1cc   : > { %v1287_v24 = vadd.f32 %v1277_v23, %v2260_v22 }
 0x1ce   : > { %v1323_v49 = vsub.f32 %v1287_v24, %v1309_v25 }
 0x1d0   : > { %v1327_v27 = vmax.f32 %v1323_v49, 0.0 }
 0x1d2   : > { %1883 = vrsqrt.f32 %v1327_v27  ;;  %vm1338_vm4 = vcmp.eq.f32.partialorder %v1327_v27, inf  ;;  %v1341_v43 = vand.u32 2147483648, %v1327_v27  ;;  %vm1340_vm5 = vcmp.eq.f32.partialorder %v1327_v27, 0.0 }
 0x1d8   : > { %v1884_v26 = vpop.eup %1883 }
 0x1d9   : > { %v1332_v30 = vmul.f32 %v1884_v26, %v1327_v27 }
 0x1db   : > { %v1333_v32 = vmul.f32 %v1884_v26, %v1332_v30 }
 0x1dd   : > { %v1334_v35 = vmul.f32 0.5, %v1333_v32 }
 0x1df   : > { %v1335_v36 = vsub.f32 1.5, %v1334_v35  ;;  %v2306_v35 = vmul.f32 2.0, %v2168_v46  ;;  %v1225_v46 = vadd.f32 %v1224_v53, %v2183_v4 }
 0x1e1   : > { %v1336_v38 = vmul.f32 %v1884_v26, %v1335_v36 }
 0x1e3   : > { %v1337_v42 = vmul.f32 %v1336_v38, %v1327_v27  ;;  %v1314_v38 = vrot.slane %v1296_v34, 5 }
 0x1e5   : > { %v1339_v45 = vsel %vm1338_vm4, %v1327_v27, %v1337_v42  ;;  %v1217_v27 = vrot.slane %v2174_v56, 4  ;;  %v1313_v42 = vrot.slane %v2306_v35, 5 }
 0x1e6   : > { %v1342_v48 = vsel %vm1340_vm5, %v1341_v43, %v1339_v45 }
 0x1e7   : > { %v2268_v50 = vsub.f32 0.0, %v1342_v48  ;;  %v1218_v26 = vadd.f32 %v1217_v27, %v2174_v56  ;;  %v1315_v45 = vsel %vm1246_vm3, %v1313_v42, %v1314_v38 }
 0x1e9   : > { %v1391_v15 = vsel %vm1201_vm1, %v2268_v50, -inf  ;;  %1387 = vst.msk [vmem:[%s2248_s30] sm:$0x1f] %vm1201_vm1, %v2268_v50  ;;  %v1219_v30 = vrot.slane %v1218_v26, 2 }
 0x1ea   : > { %1392 = vmax.xlane.f32.xlu1 %v1391_v15  ;;  %v1226_v15 = vrot.slane %v1225_v46, 2 }
 0x1eb   : > { %v1220_v32 = vadd.f32 %v1219_v30, %v1218_v26 }
 0x1ed   : > { %v1221_v36 = vrot.slane %v1220_v32, 1 }
 0x1ee   : > { %v1535_v0 = vpop.permute.xlu1 %1534  ;;  %v1280_v1 = vpop.xlane.xlu0 %1279 }
 0x1ef   : > { %v1288_v29 = vadd.f32 %v1280_v1, %v2279_v62  ;;  %v1547_v5 = vsel %vm1201_vm1, %v1535_v0, 0.0  ;;  %v2310_v43 = vadd.f32 %v1221_v36, %v1220_v32  ;;  %v1227_v0 = vadd.f32 %v1226_v15, %v1225_v46 }
 0x1f0   : > { %1548 = vadd.xlane.f32.xlu2 %v1547_v5 }
 0x1f1   : > { %v1324_v6 = vsub.f32 %v1288_v29, %v1312_v12  ;;  %v2318_v29 = vmul.f32 2.0, %v2177_v2  ;;  %v1228_v12 = vrot.slane %v1227_v0, 1 }
 0x1f3   : > { %v1328_v8 = vmax.f32 %v1324_v6, 0.0  ;;  %v2321_v4 = vadd.f32 %v1228_v12, %v1227_v0 }
 0x1f5   : > { %1885 = vrsqrt.f32 %v1328_v8  ;;  %vm1350_vm6 = vcmp.eq.f32.partialorder %v1328_v8, inf  ;;  %v1353_v60 = vand.u32 2147483648, %v1328_v8  ;;  %vm1352_vm7 = vcmp.eq.f32.partialorder %v1328_v8, 0.0 }
 0x1fb   : > { %v1886_v9 = vpop.eup %1885  ;;  %v1537_v10 = vpop.permute.xlu2 %1536 }
 0x1fc   : > { %v1550_v11 = vsel %vm1201_vm1, %v1537_v10, 0.0  ;;  %v1344_v13 = vmul.f32 %v1886_v9, %v1328_v8 }
 0x1fd   : > { %1551 = vadd.xlane.f32.xlu1 %v1550_v11 }
 0x1fe   : > { %v1345_v52 = vmul.f32 %v1886_v9, %v1344_v13 }
 0x200   : > { %v1346_v14 = vmul.f32 0.5, %v1345_v52 }
 0x202   : > { %v1347_v16 = vsub.f32 1.5, %v1346_v14 }
 0x204   : > { %v1348_v18 = vmul.f32 %v1886_v9, %v1347_v16  ;;  %v1316_v9 = vrot.slane %v2318_v29, 5 }
 0x206   : > { %v1349_v20 = vmul.f32 %v1348_v18, %v1328_v8 }
 0x208   : > { %v1351_v23 = vsel %vm1350_vm6, %v1328_v8, %v1349_v20  ;;  %1447 = vperm.xlu2 %1872, %v1440_v19   ;;  %v1317_v8 = vrot.slane %v1298_v3, 5  ;;  %v1539_v18 = vpop.permute.xlu0 %1538 }
 0x209   : > { %v1354_v24 = vsel %vm1352_vm7, %v1353_v60, %v1351_v23 }
 0x20a   : > { %v2294_v25 = vsub.f32 0.0, %v1354_v24  ;;  %v1318_v2 = vsel %vm1246_vm3, %v1316_v9, %v1317_v8 }
 0x20c   : > { %v1394_v49 = vsel %vm1201_vm1, %v2294_v25, -inf  ;;  %1388 = vst.msk [vmem:[%s2248_s30 + $0x8] sm:$0x1f] %vm1201_vm1, %v2294_v25 }
 0x20d   : > { %1395 = vmax.xlane.f32.xlu0 %v1394_v49  ;;  %v1553_v49 = vsel %vm1201_vm1, %v1539_v18, 0.0 }
 0x216   : > { %1450 = vperm.xlu1 %1873, %v1441_v28  }
 0x221   : > { %1444 = vperm.xlu0 %1871, %v1439_v37  }
 0x223   : > { %v1283_v44 = vpop.xlane.xlu1 %1282 }
 0x224   : > { %v1289_v56 = vadd.f32 %v1283_v44, %v2310_v43 }
 0x226   : > { %v1325_v48 = vsub.f32 %v1289_v56, %v1315_v45 }
 0x228   : > { %v1329_v54 = vmax.f32 %v1325_v48, 0.0 }
 0x22a   : > { %1887 = vrsqrt.f32 %v1329_v54  ;;  %vm1362_vm8 = vcmp.eq.f32.partialorder %v1329_v54, inf  ;;  %v1365_v11 = vand.u32 2147483648, %v1329_v54  ;;  %vm1364_vm9 = vcmp.eq.f32.partialorder %v1329_v54, 0.0 }
 0x230   : > { %v1888_v40 = vpop.eup %1887 }
 0x231   : > { %v1356_v58 = vmul.f32 %v1888_v40, %v1329_v54 }
 0x233   : > { %v1357_v63 = vmul.f32 %v1888_v40, %v1356_v58 }
 0x235   : > { %v1358_v1 = vmul.f32 0.5, %v1357_v63 }
 0x237   : > { %v1359_v5 = vsub.f32 1.5, %v1358_v1 }
 0x238   : > { %v1546_v23 = vpop.xlane.xlu0 %1545 }
 0x239   : > { %v1360_v6 = vmul.f32 %v1888_v40, %v1359_v5 }
 0x23b   : > { %v1361_v10 = vmul.f32 %v1360_v6, %v1329_v54 }
 0x23d   : > { %v1286_v13 = vpop.xlane.xlu2 %1285  ;;  %v1363_v52 = vsel %vm1362_vm8, %v1329_v54, %v1361_v10 }
 0x23e   : > { %v1290_v21 = vadd.f32 %v1286_v13, %v2321_v4  ;;  %v1366_v14 = vsel %vm1364_vm9, %v1365_v11, %v1363_v52 }
 0x23f   : > { %v1381_v16 = vsub.f32 0.0, %v1366_v14 }
 0x240   : > { %v1326_v19 = vsub.f32 %v1290_v21, %v1318_v2 }
 0x241   : > { %1389 = vst.msk [vmem:[%s2248_s30 + $0x10] sm:$0x1f] %vm1201_vm1, %v1381_v16  ;;  %v1397_v20 = vsel %vm1201_vm1, %v1381_v16, -inf }
 0x242   : > { %v1330_v60 = vmax.f32 %v1326_v19, 0.0  ;;  %1398 = vmax.xlane.f32.xlu2 %v1397_v20 }
 0x244   : > { %1889 = vrsqrt.f32 %v1330_v60  ;;  %vm1374_vm10 = vcmp.eq.f32.partialorder %v1330_v60, inf  ;;  %v1377_v38 = vand.u32 2147483648, %v1330_v60  ;;  %vm1376_vm11 = vcmp.eq.f32.partialorder %v1330_v60, 0.0 }
 0x245   : > { %1891 = vlog2.f32 %v1546_v23 }
 0x24a   : > { %v1890_v24 = vpop.eup %1889 }
 0x24b   : > { %1554 = vadd.xlane.f32.xlu0 %v1553_v49  ;;  %v1368_v27 = vmul.f32 %v1890_v24, %v1330_v60  ;;  %v1892_v30 = vpop.eup %1891 }
 0x24c   : > { %v1557_v36 = vmul.f32 0.6931472, %v1892_v30 }
 0x24d   : > { %v1369_v26 = vmul.f32 %v1890_v24, %v1368_v27 }
 0x24e   : > { %v1564_v44 = vsub.f32 %v2207_v33, %v1557_v36 }
 0x24f   : > { %v1370_v28 = vmul.f32 0.5, %v1369_v26 }
 0x251   : > { %v1371_v32 = vsub.f32 1.5, %v1370_v28  ;;  %v1442_v28 = vld [vmem:[%s2291_s9 + $0x18] sm:$0x1f] }
 0x253   : > { %v1372_v34 = vmul.f32 %v1890_v24, %v1371_v32 }
 0x255   : > { %v1373_v37 = vmul.f32 %v1372_v34, %v1330_v60 }
 0x257   : > { %v1375_v42 = vsel %vm1374_vm10, %v1330_v60, %v1373_v37  ;;  %vm1483_vm10 = vcmask 1041409  }
 0x258   : > { %v1378_v56 = vsel %vm1376_vm11, %v1377_v38, %v1375_v42  ;;  %vm1485_vm11 = vcmask 1042434  }
 0x259   : > { %v1382_v45 = vsub.f32 0.0, %v1378_v56 }
 0x25a   : > { %1572 = vrot.lane.b32.xlu2 %v1564_v44, %s1937_s26 }
 0x25b   : > { %1390 = vst.msk [vmem:[%s2248_s30 + $0x18] sm:$0x1f] %vm1201_vm1, %v1382_v45  ;;  %v1400_v48 = vsel %vm1201_vm1, %v1382_v45, -inf }
 0x25c   : > { %1401 = vmax.xlane.f32.xlu1 %v1400_v48 }
 0x25d   : > { %v1393_v63 = vpop.xlane.xlu1 %1392 }
 0x25e   : > { %v2342_v3 = vsub.f32 %v2268_v50, %v1393_v63  ;;  %v1619_v50 = vadd.f32 %v2239_v7, %v2310_v43  ;;  %v1617_v43 = vadd.f32 %v2204_v31, %v2260_v22 }
 0x260   : > { %v1407_v5 = vmul.f32 1.442695, %v2342_v3  ;;  %v1623_v21 = vsub.f32 %v1619_v50, %v2306_v35  ;;  %v1621_v60 = vsub.f32 %v1617_v43, %v2254_v17 }
 0x262   : > { %v1627_v18 = vmax.f32 %v1623_v21, 0.0  ;;  %v1625_v27 = vmax.f32 %v1621_v60, 0.0 }
 0x263   : > { %v1549_v53 = vpop.xlane.xlu2 %1548 }
 0x264   : > { %1893 = vlog2.f32 %v1549_v53  ;;  %v1631_v7 = vsel %vm2120_vm0, 0.0, %v1627_v18  ;;  %v1629_v30 = vsel %vm2120_vm0, 0.0, %v1625_v27 }
 0x265   : > { %vm1664_vm12 = vcmp.eq.f32.partialorder %v1631_v7, inf  ;;  %vm1666_vm13 = vcmp.eq.f32.partialorder %v1631_v7, 0.0  ;;  %vm1640_vm14 = vcmp.eq.f32.partialorder %v1629_v30, inf  ;;  %vm1642_vm15 = vcmp.eq.f32.partialorder %v1629_v30, 0.0 }
 0x26a   : > { %v1894_v54 = vpop.eup %1893 }
 0x26b   : > { %v1559_v46 = vmul.f32 0.6931472, %v1894_v54 }
 0x26d   : > { %v1565_v40 = vsub.f32 %v2217_v59, %v1559_v46 }
 0x270   : > { %v1552_v13 = vpop.xlane.xlu1 %1551 }
 0x275   : > { %1574 = vrot.lane.b32.xlu1 %v1565_v40, %s1937_s26 }
 0x280   : > { %v1396_v15 = vpop.xlane.xlu0 %1395 }
 0x281   : > { %v2337_v33 = vsub.f32 %v2294_v25, %v1396_v15  ;;  %v2346_v25 = vpop.permute.xlu2 %1447  ;;  %v1667_v15 = vand.u32 2147483648, %v1631_v7 }
 0x282   : > { %vm1456_vm4 = vcmp.eq.s32.totalorder %v2117_v41, %v2346_v25 }
 0x283   : > { %v1409_v58 = vmul.f32 1.442695, %v2337_v33 }
 0x285   : > { %1895 = vpow2.f32 %v1409_v58 }
 0x286   : > { %1897 = vpow2.f32 %v1407_v5 }
 0x28b   : > { %v1896_v0 = vpop.eup %1895 }
 0x28c   : > { %v1418_v1 = vsel %vm1201_vm1, %v1896_v0, 0.0  ;;  %v1898_v59 = vpop.eup %1897 }
 0x28d   : > { %1419 = vadd.xlane.f32.xlu0 %v1418_v1  ;;  %v1415_v12 = vsel %vm1201_vm1, %v1898_v59, 0.0 }
 0x293   : > { %v2348_v6 = vpop.permute.xlu0 %1444 }
 0x294   : > { %vm1455_vm7 = vcmp.eq.s32.totalorder %v2117_v41, %v2348_v6 }
 0x29f   : > { %1416 = vadd.xlane.f32.xlu1 %v1415_v12 }
 0x2b5   : > { %v1399_v8 = vpop.xlane.xlu2 %1398 }
 0x2b6   : > { %v2350_v9 = vsub.f32 %v1381_v16, %v1399_v8  ;;  %v2357_v16 = vpop.permute.xlu1 %1450 }
 0x2b7   : > { %vm1457_vm8 = vcmp.eq.s32.totalorder %v2117_v41, %v2357_v16 }
 0x2b8   : > { %v1411_v10 = vmul.f32 1.442695, %v2350_v9 }
 0x2ba   : > { %1899 = vpow2.f32 %v1411_v10 }
 0x2be   : > { %v1555_v11 = vpop.xlane.xlu0 %1554 }
 0x2bf   : > { %1901 = vlog2.f32 %v1555_v11 }
 0x2c0   : > { %v1900_v52 = vpop.eup %1899  ;;  %1903 = vrsqrt.f32 %v1631_v7 }
 0x2c1   : > { %v1421_v14 = vsel %vm1201_vm1, %v1900_v52, 0.0  ;;  %v1643_v52 = vand.u32 2147483648, %v1629_v30 }
 0x2c2   : > { %1422 = vadd.xlane.f32.xlu2 %v1421_v14 }
 0x2c5   : > { %v1902_v2 = vpop.eup %1901 }
 0x2c6   : > { %v1563_v19 = vmul.f32 0.6931472, %v1902_v2  ;;  %v1904_v24 = vpop.eup %1903 }
 0x2c7   : > { %v1658_v26 = vmul.f32 %v1904_v24, %v1631_v7 }
 0x2c8   : > { %v1567_v20 = vsub.f32 %v2226_v55, %v1563_v19  ;;  %v1620_v55 = vadd.f32 %v2224_v51, %v2321_v4 }
 0x2c9   : > { %v1659_v22 = vmul.f32 %v1904_v24, %v1658_v26 }
 0x2ca   : > { %1578 = vrot.lane.b32.xlu0 %v1567_v20, %s1937_s26  ;;  %v1624_v31 = vsub.f32 %v1620_v55, %v2318_v29  ;;  %v1618_v29 = vadd.f32 %v2214_v39, %v2279_v62  ;;  %v1573_v55 = vpop.permute.xlu2 %1572 }
 0x2cb   : > { %v1660_v36 = vmul.f32 0.5, %v1659_v22 }
 0x2cc   : > { %v1628_v34 = vmax.f32 %v1624_v31, 0.0  ;;  %v1622_v53 = vsub.f32 %v1618_v29, %v2277_v57  ;;  %v1584_v31 = vsel %vm2120_vm0, %v1573_v55, 0.0 }
 0x2cd   : > { %v1661_v37 = vsub.f32 1.5, %v1660_v36 }
 0x2ce   : > { %v1632_v51 = vsel %vm2120_vm0, 0.0, %v1628_v34  ;;  %v1626_v63 = vmax.f32 %v1622_v53, 0.0 }
 0x2cf   : > { %v1402_v35 = vpop.xlane.xlu1 %1401  ;;  %v1662_v42 = vmul.f32 %v1904_v24, %v1661_v37  ;;  %vm1676_vm2 = vcmp.eq.f32.partialorder %v1632_v51, inf  ;;  %vm1678_vm3 = vcmp.eq.f32.partialorder %v1632_v51, 0.0 }
 0x2d0   : > { %v2366_v23 = vsub.f32 %v1382_v45, %v1402_v35  ;;  %v1630_v62 = vsel %vm2120_vm0, 0.0, %v1626_v63 }
 0x2d1   : > { %v1663_v45 = vmul.f32 %v1662_v42, %v1631_v7  ;;  %vm1652_vm5 = vcmp.eq.f32.partialorder %v1630_v62, inf  ;;  %v1655_v25 = vand.u32 2147483648, %v1630_v62  ;;  %vm1654_vm6 = vcmp.eq.f32.partialorder %v1630_v62, 0.0 }
 0x2d2   : > { %v1413_v49 = vmul.f32 1.442695, %v2366_v23 }
 0x2d3   : > { %v1665_v40 = vsel %vm1664_vm12, %v1631_v7, %v1663_v45  ;;  %v1679_v7 = vand.u32 2147483648, %v1632_v51  ;;  %vm1487_vm12 = vcmask 1043459  }
 0x2d4   : > { %1905 = vpow2.f32 %v1413_v49  ;;  %v1668_v0 = vsel %vm1666_vm13, %v1667_v15, %v1665_v40 }
 0x2d5   : > { %1907 = vrsqrt.f32 %v1629_v30  ;;  %v1687_v59 = vsel %vm1201_vm1, %v1668_v0, 0.0 }
 0x2d6   : > { %1909 = vrsqrt.f32 %v1632_v51 }
 0x2d7   : > { %1911 = vlog2.f32 %v1552_v13 }
 0x2d8   : > { %1913 = vrsqrt.f32 %v1630_v62 }
 0x2da   : > { %v1906_v32 = vpop.eup %1905  ;;  %1453 = vperm.xlu2 %1872, %v1442_v28  }
 0x2db   : > { %v1424_v17 = vsel %vm1201_vm1, %v1906_v32, 0.0  ;;  %v1908_v4 = vpop.eup %1907 }
 0x2dc   : > { %1425 = vadd.xlane.f32.xlu1 %v1424_v17  ;;  %v1634_v38 = vmul.f32 %v1908_v4, %v1629_v30  ;;  %v1910_v56 = vpop.eup %1909  ;;  %v1588_v17 = vsel %vm1201_vm1, %v1584_v31, 0.0 }
 0x2dd   : > { %v1912_v48 = vpop.eup %1911  ;;  %v1670_v46 = vmul.f32 %v1910_v56, %v1632_v51 }
 0x2de   : > { %v1635_v44 = vmul.f32 %v1908_v4, %v1634_v38  ;;  %v1561_v58 = vmul.f32 0.6931472, %v1912_v48  ;;  %v1914_v13 = vpop.eup %1913 }
 0x2df   : > { %v1671_v5 = vmul.f32 %v1910_v56, %v1670_v46  ;;  %v1646_v2 = vmul.f32 %v1914_v13, %v1630_v62 }
 0x2e0   : > { %v1636_v54 = vmul.f32 0.5, %v1635_v44  ;;  %v1566_v39 = vsub.f32 %v2229_v61, %v1561_v58 }
 0x2e1   : > { %v1672_v12 = vmul.f32 0.5, %v1671_v5  ;;  %v1647_v20 = vmul.f32 %v1914_v13, %v1646_v2 }
 0x2e2   : > { %v1637_v1 = vsub.f32 1.5, %v1636_v54 }
 0x2e3   : > { %v1673_v10 = vsub.f32 1.5, %v1672_v12  ;;  %v1648_v24 = vmul.f32 0.5, %v1647_v20 }
 0x2e4   : > { %v1638_v57 = vmul.f32 %v1908_v4, %v1637_v1 }
 0x2e5   : > { %v1674_v11 = vmul.f32 %v1910_v56, %v1673_v10  ;;  %v1649_v28 = vsub.f32 1.5, %v1648_v24 }
 0x2e6   : > { %v1639_v8 = vmul.f32 %v1638_v57, %v1629_v30 }
 0x2e7   : > { %v1675_v61 = vmul.f32 %v1674_v11, %v1632_v51  ;;  %v1575_v22 = vpop.permute.xlu1 %1574  ;;  %v1650_v32 = vmul.f32 %v1914_v13, %v1649_v28 }
 0x2e8   : > { %v1641_v50 = vsel %vm1640_vm14, %v1629_v30, %v1639_v8  ;;  %v1585_v38 = vsel %vm2120_vm0, %v1575_v22, 0.0 }
 0x2e9   : > { %v1644_v21 = vsel %vm1642_vm15, %v1643_v52, %v1641_v50  ;;  %v1677_v19 = vsel %vm1676_vm2, %v1632_v51, %v1675_v61  ;;  %v1651_v34 = vmul.f32 %v1650_v32, %v1630_v62  ;;  %v1591_v29 = vsel %vm1201_vm1, %v1585_v38, 0.0 }
 0x2ea   : > { %v1681_v18 = vsel %vm1201_vm1, %v1644_v21, 0.0  ;;  %v1680_v35 = vsel %vm1678_vm3, %v1679_v7, %v1677_v19  ;;  %v1940_v38 = vmov 5.0   ;;  %vm1727_vm3 = vcmask 3072  }
 0x2eb   : > { %v1690_v49 = vsel %vm1201_vm1, %v1680_v35, 0.0  ;;  %v1653_v36 = vsel %vm1652_vm5, %v1630_v62, %v1651_v34 }
 0x2ec   : > { %v1656_v51 = vsel %vm1654_vm6, %v1655_v25, %v1653_v36 }
 0x2ed   : > { %v1684_v4 = vsel %vm1201_vm1, %v1656_v51, 0.0 }
 0x2f4   : > { %1688 = vadd.xlane.f32.xlu0 %v1687_v59 }
 0x2f5   : > { %1576 = vrot.lane.b32.xlu1 %v1566_v39, %s1937_s26 }
 0x300   : > { %v1420_v14 = vpop.xlane.xlu0 %1419 }
 0x301   : > { %1915 = vlog2.f32 %v1420_v14 }
 0x303   : > { %1682 = vadd.xlane.f32.xlu2 %v1681_v18 }
 0x307   : > { %v1916_v43 = vpop.eup %1915 }
 0x308   : > { %v1430_v60 = vmul.f32 0.6931472, %v1916_v43 }
 0x30a   : > { %v1436_v27 = vsub.f32 %v2337_v33, %v1430_v60 }
 0x30b   : > { %1691 = vadd.xlane.f32.xlu2 %v1690_v49 }
 0x30c   : > { %v1460_v26 = vsel %vm1456_vm4, %v1436_v27, 0.0 }
 0x30d   : > { %v1466_v30 = vsel %vm1201_vm1, %v1460_v26, 0.0 }
 0x30e   : > { %1467 = vadd.xlane.f32.xlu0 %v1466_v30 }
 0x312   : > { %v1417_v33 = vpop.xlane.xlu1 %1416 }
 0x313   : > { %1589 = vadd.xlane.f32.xlu2 %v1588_v17  ;;  %1917 = vlog2.f32 %v1417_v33 }
 0x319   : > { %v1918_v37 = vpop.eup %1917 }
 0x31a   : > { %v1428_v42 = vmul.f32 0.6931472, %v1918_v37 }
 0x31c   : > { %v1435_v44 = vsub.f32 %v2342_v3, %v1428_v42 }
 0x31e   : > { %v1459_v56 = vsel %vm1455_vm7, %v1435_v44, 0.0 }
 0x31f   : > { %1685 = vadd.xlane.f32.xlu1 %v1684_v4  ;;  %v1463_v45 = vsel %vm1201_vm1, %v1459_v56, 0.0 }
 0x327   : > { %1592 = vadd.xlane.f32.xlu1 %v1591_v29 }
 0x32f   : > { %1464 = vadd.xlane.f32.xlu1 %v1463_v45 }
 0x335   : > { %v1423_v48 = vpop.xlane.xlu2 %1422 }
 0x336   : > { %1919 = vlog2.f32 %v1423_v48 }
 0x33c   : > { %v1920_v53 = vpop.eup %1919  ;;  %v1579_v3 = vpop.permute.xlu0 %1578 }
 0x33d   : > { %v1432_v54 = vmul.f32 0.6931472, %v1920_v53  ;;  %v1587_v6 = vsel %vm2120_vm0, %v1579_v3, 0.0  ;;  %v1454_v1 = vpop.permute.xlu2 %1453 }
 0x33e   : > { %v1597_v58 = vsel %vm1201_vm1, %v1587_v6, 0.0  ;;  %vm1458_vm9 = vcmp.eq.s32.totalorder %v2117_v41, %v1454_v1 }
 0x33f   : > { %v1437_v46 = vsub.f32 %v2350_v9, %v1432_v54 }
 0x341   : > { %v1461_v40 = vsel %vm1457_vm8, %v1437_v46, 0.0 }
 0x342   : > { %v1469_v15 = vsel %vm1201_vm1, %v1461_v40, 0.0 }
 0x343   : > { %1470 = vadd.xlane.f32.xlu0 %v1469_v15 }
 0x34b   : > { %1598 = vadd.xlane.f32.xlu0 %v1597_v58 }
 0x34f   : > { %v1426_v63 = vpop.xlane.xlu1 %1425 }
 0x350   : > { %1921 = vlog2.f32 %v1426_v63 }
 0x356   : > { %v1922_v0 = vpop.eup %1921 }
 0x357   : > { %v1434_v5 = vmul.f32 0.6931472, %v1922_v0 }
 0x359   : > { %v1438_v9 = vsub.f32 %v2366_v23, %v1434_v5 }
 0x35b   : > { %v1462_v16 = vsel %vm1458_vm9, %v1438_v9, 0.0 }
 0x35c   : > { %v1472_v59 = vsel %vm1201_vm1, %v1462_v16, 0.0 }
 0x35d   : > { %1473 = vadd.xlane.f32.xlu1 %v1472_v59 }
 0x367   : > { %v1577_v39 = vpop.permute.xlu1 %1576  ;;  %v1689_v8 = vpop.xlane.xlu0 %1688 }
 0x368   : > { %v1586_v62 = vsel %vm2120_vm0, %v1577_v39, 0.0  ;;  %v1699_v13 = vperm.slane %v1689_v8, %v2117_v41  ;;  %vm1490_vm0 = vcmask 35840  }
 0x369   : > { %v1594_v57 = vsel %vm1201_vm1, %v1586_v62, 0.0 }
 0x36a   : > { %1595 = vadd.xlane.f32.xlu2 %v1594_v57 }
 0x376   : > { %v1683_v12 = vpop.xlane.xlu2 %1682 }
 0x377   : > { %v1697_v23 = vperm.slane %v1683_v12, %v2117_v41 }
 0x37e   : > { %v1692_v10 = vpop.xlane.xlu2 %1691 }
 0x37f   : > { %v1700_v52 = vperm.slane %v1692_v10, %v2117_v41 }
 0x381   : > { %v1468_v18 = vpop.xlane.xlu0 %1467 }
 0x382   : > { %v1480_v35 = vperm.slane %v1468_v18, %v2117_v41 }
 0x386   : > { %v1590_v28 = vpop.xlane.xlu2 %1589 }
 0x387   : > { %v1604_v22 = vperm.slane %v1590_v28, %v2117_v41 }
 0x392   : > { %v1686_v50 = vpop.xlane.xlu1 %1685 }
 0x393   : > { %v1698_v11 = vperm.slane %v1686_v50, %v2117_v41 }
 0x395   : > { %v1701_v47 = vsel %vm1483_vm10, %v1698_v11, %v1697_v23 }
 0x396   : > { %v1702_v21 = vsel %vm1485_vm11, %v1699_v13, %v1701_v47 }
 0x397   : > { %v1703_v14 = vsel %vm1487_vm12, %v1700_v52, %v1702_v21 }
 0x398   : > { %v1705_v61 = vsel %vm1490_vm0, %v1703_v14, 0.0 }
 0x399   : > { %1706 = vadd.xlane.f32.xlu2 %v1705_v61 }
 0x39a   : > { %v1593_v2 = vpop.xlane.xlu1 %1592 }
 0x39b   : > { %v1605_v30 = vperm.slane %v1593_v2, %v2117_v41 }
 0x39d   : > { %v1608_v34 = vsel %vm1483_vm10, %v1605_v30, %v1604_v22 }
 0x3a2   : > { %v1465_v19 = vpop.xlane.xlu1 %1464 }
 0x3a3   : > { %v1479_v7 = vperm.slane %v1465_v19, %v2117_v41 }
 0x3a5   : > { %v1484_v24 = vsel %vm1483_vm10, %v1480_v35, %v1479_v7 }
 0x3b6   : > { %v1471_v20 = vpop.xlane.xlu0 %1470 }
 0x3b7   : > { %v1481_v43 = vperm.slane %v1471_v20, %v2117_v41 }
 0x3b9   : > { %v1486_v27 = vsel %vm1485_vm11, %v1481_v43, %v1484_v24 }
 0x3be   : > { %v1599_v31 = vpop.xlane.xlu0 %1598 }
 0x3bf   : > { %v1607_v33 = vperm.slane %v1599_v31, %v2117_v41 }
 0x3d0   : > { %v1474_v60 = vpop.xlane.xlu1 %1473 }
 0x3d1   : > { %v1482_v49 = vperm.slane %v1474_v60, %v2117_v41 }
 0x3d3   : > { %v1488_v55 = vsel %vm1487_vm12, %v1482_v49, %v1486_v27 }
 0x3d4   : > { %v1491_v26 = vsel %vm1490_vm0, %v1488_v55, 0.0 }
 0x3d5   : > { %1492 = vadd.xlane.f32.xlu1 %v1491_v26 }
 0x3dd   : > { %v1596_v32 = vpop.xlane.xlu2 %1595 }
 0x3de   : > { %v1606_v17 = vperm.slane %v1596_v32, %v2117_v41 }
 0x3e0   : > { %v1609_v36 = vsel %vm1485_vm11, %v1606_v17, %v1608_v34 }
 0x3e1   : > { %v1610_v25 = vsel %vm1487_vm12, %v1607_v33, %v1609_v36 }
 0x3e2   : > { %v1612_v51 = vsel %vm1490_vm0, %v1610_v25, 0.0 }
 0x3e3   : > { %1613 = vadd.xlane.f32.xlu0 %v1612_v51 }
 0x40c   : > { %v1707_v4 = vpop.xlane.xlu2 %1706 }
 0x40d   : > { %v1708_v37 = vmul.f32 0.5, %v1707_v4 }
 0x40f   : > { %1923 = vrcp.f32 %v1708_v37  ;;  %v1720_v40 = vand.u32 2147483648, %v1708_v37  ;;  %vm1714_vm14 = vweird.f32 %v1708_v37  ;;  %v1718_v3 = vand.u32 2147483647, %v1708_v37 }
 0x410   : > { %1925 = vrcp.f32 %v1940_v38 }
 0x411   : > { %v1721_v0 = vor.u32 1.1754944e-38, %v1720_v40  ;;  %vm1719_vm2 = vcmp.eq.f32.partialorder %v1718_v3, 8.507059e+37 }
 0x415   : > { %v1924_v42 = vpop.eup %1923 }
 0x416   : > { %v1926_v29 = vpop.eup %1925  ;;  %v1710_v44 = vmul.f32 %v1924_v42, %v1708_v37  ;;  %vm1715_vm1 = vweird.f32 %v1924_v42 }
 0x417   : > { %v1496_v56 = vmul.f32 5.0, %v1926_v29  ;;  %vm1500_vm13 = vweird.f32 %v1926_v29  ;;  %vm1716_vm15 = vmor %vm1714_vm14, %vm1715_vm1 }
 0x418   : > { %v1711_v45 = vsub.f32 1.0, %v1710_v44 }
 0x419   : > { %v1497_v48 = vsub.f32 1.0, %v1496_v56 }
 0x41a   : > { %v1712_v41 = vmul.f32 %v1924_v42, %v1711_v45 }
 0x41b   : > { %v1498_v53 = vmul.f32 %v1926_v29, %v1497_v48 }
 0x41c   : > { %v1713_v54 = vadd.f32 %v1924_v42, %v1712_v41 }
 0x41d   : > { %v1499_v46 = vadd.f32 %v1926_v29, %v1498_v53 }
 0x41e   : > { %v1717_v6 = vsel %vm1716_vm15, %v1924_v42, %v1713_v54 }
 0x41f   : > { %v1501_v63 = vsel %vm1500_vm13, %v1926_v29, %v1499_v46  ;;  %v1722_v1 = vsel %vm1719_vm2, %v1721_v0, %v1717_v6 }
 0x420   : > { %v1723_v59 = vmul.f32 10.0, %v1722_v1 }
 0x448   : > { %v1493_v15 = vpop.xlane.xlu1 %1492 }
 0x449   : > { %v1494_v58 = vsub.f32 0.0, %v1493_v15 }
 0x44b   : > { %v1502_v9 = vmul.f32 %v1501_v63, %v1494_v58 }
 0x44d   : > { %v1724_v62 = vmul.f32 %v1723_v59, %v1502_v9 }
 0x456   : > { %v1614_v5 = vpop.xlane.xlu0 %1613 }
 0x457   : > { %v1615_v16 = vsub.f32 0.0, %v1614_v5 }
 0x459   : > { %v1616_v39 = vmul.f32 %v1615_v16, %v1501_v63 }
 0x45b   : > { %v1725_v57 = vmul.f32 0.25, %v1616_v39 }
 0x45d   : > { %v1726_v12 = vadd.f32 %v1725_v57, %v1724_v62 }
 0x45f   : > { %1728 = vst.msk [vmem:[%s309_s12] sm:$0xf] %vm1727_vm3, %v1726_v12 }
 0x460 PF: > { %s17_s21 = sadd.s32 1, %s1933_s21  }
 0x461   : > { %p14_p5 = scmp.ge.s32.totalorder %s17_s21, 4  }
 0x463   :  { %16 = sbr.rel (!%p14_p5) target bundleno = 1 (0x1), region = 88 }

</bundles_post_ra>
